<compile_context>
chip_gen: v7x
topology: tpu7x:2x2x1
jax: 0.10.0
libtpu: 0.0.40
codegen_flags: <defaults>
</compile_context>

<pallas_src>
import math
from functools import partial

import jax
import jax.numpy as jnp
from jax.experimental import pallas as pl
from jax.experimental.pallas import tpu as pltpu

NEG_INF = -1e30                     # additive-mask value (exp underflows to 0)
VMEM_LIMIT = 48 * 1024 * 1024       # raise scoped VMEM above the 16/32 MiB defaults,
                                    # but keep headroom on v7x (64 MiB physical)


def _pick_tile(dim, target, align):
    """Largest `align`-aligned divisor of `dim` that is <= target; else the full dim."""
    if dim <= target:
        return dim
    t = (target // align) * align
    while t >= align:
        if dim % t == 0:
            return t
        t -= align
    return dim


# --------------------------- 1. fused QKV / linear ---------------------------

def _linear_kernel(x_ref, w_ref, b_ref, o_ref):
    # y = x @ W + b : operands kept in input dtype (bf16-friendly), f32 accumulate.
    acc = jnp.dot(x_ref[...], w_ref[...], preferred_element_type=jnp.float32)
    o_ref[...] = (acc + b_ref[...].astype(jnp.float32)).astype(o_ref.dtype)


def linear_pallas(x2d, w, b, *, tm_target=256, tn_target=256):
    # TODO(synk): K (d_model) is kept whole per block; tile K with an f32 accumulator
    # grid axis for very large d_model.
    M, K = x2d.shape
    N = w.shape[1]
    tm = _pick_tile(M, tm_target, 8)
    tn = _pick_tile(N, tn_target, 128)
    flops = 2 * M * K * N
    bytes_accessed = (M * K + K * N + M * N + N) * x2d.dtype.itemsize
    return pl.pallas_call(
        _linear_kernel,
        out_shape=jax.ShapeDtypeStruct((M, N), x2d.dtype),
        grid=(M // tm, N // tn),
        in_specs=[
            pl.BlockSpec((tm, K), lambda m, n: (m, 0)),
            pl.BlockSpec((K, tn), lambda m, n: (0, n)),
            pl.BlockSpec((1, tn), lambda m, n: (0, n)),
        ],
        out_specs=pl.BlockSpec((tm, tn), lambda m, n: (m, n)),
        compiler_params=pltpu.CompilerParams(
            dimension_semantics=("parallel", "parallel"),
            vmem_limit_bytes=VMEM_LIMIT),
        cost_estimate=pl.CostEstimate(flops=flops, transcendentals=0,
                                      bytes_accessed=bytes_accessed),
    )(x2d, w, b)


# ------------- 2. pcpt: self-attn + out_proj + residual + LN1 ---------------

def _pcpt_attn_kernel(qkv_ref, res_ref, wo_ref, bo_ref, g_ref, beta_ref, o_ref,
                      *, Sp, H, Dh, eps):
    # TODO(synk): for long sequences, switch to a KV-tiled online-softmax (flash)
    # formulation with m/l/acc scratch instead of per-head (Sq, Sk) scores in VMEM.
    E = H * Dh
    scale = 1.0 / math.sqrt(Dh)
    in_dtype = qkv_ref.dtype

    qkv = qkv_ref[0]                           # (Sp+Sg, 3E); only pcpt rows used
    q_all = qkv[:Sp, 0:E]
    k_all = qkv[:Sp, E:2 * E]
    v_all = qkv[:Sp, 2 * E:3 * E]
    wo = wo_ref[...]

    attn = bo_ref[...].astype(jnp.float32)     # (1, E), broadcasts over query rows
    for h in range(H):                         # static unroll over heads (in-kernel split)
        sl = slice(h * Dh, (h + 1) * Dh)
        qh = (q_all[:, sl].astype(jnp.float32) * scale).astype(in_dtype)  # fold scale into q
        kh = k_all[:, sl]
        vh = v_all[:, sl]
        s = jax.lax.dot_general(qh, kh, (((1,), (1,)), ((), ())),
                                preferred_element_type=jnp.float32)       # (Sp, Sp)
        mx = jnp.max(s, axis=-1, keepdims=True)
        p = jnp.exp(s - mx)
        l = jnp.sum(p, axis=-1, keepdims=True)
        p = p * pl.reciprocal(l, approx=True)                             # EUP slot
        ctx = jnp.dot(p.astype(in_dtype), vh, preferred_element_type=jnp.float32)
        # out_proj folded per head:  concat_h(ctx_h) @ Wo == sum_h ctx_h @ Wo[h*Dh:(h+1)*Dh]
        attn = attn + jnp.dot(ctx.astype(wo.dtype), wo[sl, :],
                              preferred_element_type=jnp.float32)

    # residual + LayerNorm1 epilogue (f32 VPU math)
    x = attn + res_ref[0].astype(jnp.float32)
    mu = jnp.mean(x, axis=-1, keepdims=True)
    var = jnp.mean((x - mu) ** 2, axis=-1, keepdims=True)
    y = (x - mu) * jax.lax.rsqrt(var + eps)
    o_ref[0] = (y * g_ref[...].astype(jnp.float32)
                + beta_ref[...].astype(jnp.float32)).astype(o_ref.dtype)


def pcpt_attn_pallas(qkv_all, pcpt_res, w_out, b_out, ln_g, ln_b, *, Sp, H, Dh, eps):
    B, S_all, threeE = qkv_all.shape
    E = H * Dh
    flops = 4 * B * H * Sp * Sp * Dh + 2 * B * Sp * E * E
    trans = B * H * Sp * Sp
    bytes_accessed = (B * S_all * threeE + 2 * B * Sp * E + E * E + 3 * E) * qkv_all.dtype.itemsize
    return pl.pallas_call(
        partial(_pcpt_attn_kernel, Sp=Sp, H=H, Dh=Dh, eps=eps),
        out_shape=jax.ShapeDtypeStruct((B, Sp, E), pcpt_res.dtype),
        grid=(B,),
        in_specs=[
            pl.BlockSpec((1, S_all, threeE), lambda b: (b, 0, 0)),
            pl.BlockSpec((1, Sp, E), lambda b: (b, 0, 0)),
            pl.BlockSpec((E, E), lambda b: (0, 0)),
            pl.BlockSpec((1, E), lambda b: (0, 0)),
            pl.BlockSpec((1, E), lambda b: (0, 0)),
            pl.BlockSpec((1, E), lambda b: (0, 0)),
        ],
        out_specs=pl.BlockSpec((1, Sp, E), lambda b: (b, 0, 0)),
        compiler_params=pltpu.CompilerParams(
            dimension_semantics=("parallel",),
            vmem_limit_bytes=VMEM_LIMIT),
        cost_estimate=pl.CostEstimate(flops=flops, transcendentals=trans,
                                      bytes_accessed=bytes_accessed),
    )(qkv_all, pcpt_res, w_out, b_out, ln_g, ln_b)


# ---- 3. gen: cross-attn in-proj + attn + out_proj + residual + LN1 ----------

def _gen_attn_kernel(qkv_ref, res_ref, win_ref, bin_ref, wo_ref, bo_ref,
                     g_ref, beta_ref, o_ref, *, Sp, Sg, H, Dh, eps):
    E = H * Dh
    Sk = Sp + Sg
    scale = 1.0 / math.sqrt(Dh)
    in_dtype = qkv_ref.dtype

    qkv = qkv_ref[0]                           # (Sp+Sg, 3E)
    cross_q = qkv[Sp:, 0:E]                    # (Sg, E)  gen query slice (Wqkv-projected)
    cross_k = qkv[:, E:2 * E]                  # (Sk, E)  pcpt||gen key slice
    cross_v = qkv[:, 2 * E:3 * E]              # (Sk, E)

    win = win_ref[...]
    b_in = bin_ref[...].astype(jnp.float32)
    # nn.MultiheadAttention in-projection (applied on already Wqkv-projected q/k/v,
    # exactly like the reference module)
    q2 = jnp.dot(cross_q, win[:, 0:E], preferred_element_type=jnp.float32) + b_in[:, 0:E]
    k2 = jnp.dot(cross_k, win[:, E:2 * E], preferred_element_type=jnp.float32) + b_in[:, E:2 * E]
    v2 = jnp.dot(cross_v, win[:, 2 * E:3 * E], preferred_element_type=jnp.float32) + b_in[:, 2 * E:3 * E]
    q2 = (q2 * scale).astype(in_dtype)         # fold softmax scale into q
    k2 = k2.astype(in_dtype)
    v2 = v2.astype(in_dtype)

    # additive mask built in-kernel: gen query i sees all pcpt keys + only its own gen key
    qi = jax.lax.broadcasted_iota(jnp.int32, (Sg, Sk), 0)
    ki = jax.lax.broadcasted_iota(jnp.int32, (Sg, Sk), 1)
    add_mask = jnp.where((ki < Sp) | (ki == qi + Sp), 0.0, NEG_INF).astype(jnp.float32)

    wo = wo_ref[...]
    attn = bo_ref[...].astype(jnp.float32)
    for h in range(H):
        sl = slice(h * Dh, (h + 1) * Dh)
        qh = q2[:, sl]
        kh = k2[:, sl]
        vh = v2[:, sl]
        s = jax.lax.dot_general(qh, kh, (((1,), (1,)), ((), ())),
                                preferred_element_type=jnp.float32) + add_mask  # (Sg, Sk)
        mx = jnp.max(s, axis=-1, keepdims=True)
        p = jnp.exp(s - mx)
        l = jnp.sum(p, axis=-1, keepdims=True)
        p = p * pl.reciprocal(l, approx=True)
        ctx = jnp.dot(p.astype(in_dtype), vh, preferred_element_type=jnp.float32)
        attn = attn + jnp.dot(ctx.astype(wo.dtype), wo[sl, :],
                              preferred_element_type=jnp.float32)

    x = attn + res_ref[0].astype(jnp.float32)
    mu = jnp.mean(x, axis=-1, keepdims=True)
    var = jnp.mean((x - mu) ** 2, axis=-1, keepdims=True)
    y = (x - mu) * jax.lax.rsqrt(var + eps)
    o_ref[0] = (y * g_ref[...].astype(jnp.float32)
                + beta_ref[...].astype(jnp.float32)).astype(o_ref.dtype)


def gen_attn_pallas(qkv_all, gen_res, w_in, b_in, w_c_out, b_c_out, ln_g, ln_b,
                    *, Sp, Sg, H, Dh, eps):
    B, S_all, threeE = qkv_all.shape
    E = H * Dh
    Sk = Sp + Sg
    flops = (2 * B * (Sg + 2 * Sk) * E * E) + (4 * B * H * Sg * Sk * Dh) + (2 * B * Sg * E * E)
    trans = B * H * Sg * Sk
    bytes_accessed = (B * S_all * threeE + 2 * B * Sg * E
                      + E * 3 * E + 3 * E + E * E + 3 * E) * qkv_all.dtype.itemsize
    return pl.pallas_call(
        partial(_gen_attn_kernel, Sp=Sp, Sg=Sg, H=H, Dh=Dh, eps=eps),
        out_shape=jax.ShapeDtypeStruct((B, Sg, E), gen_res.dtype),
        grid=(B,),
        in_specs=[
            pl.BlockSpec((1, S_all, threeE), lambda b: (b, 0, 0)),
            pl.BlockSpec((1, Sg, E), lambda b: (b, 0, 0)),
            pl.BlockSpec((E, 3 * E), lambda b: (0, 0)),
            pl.BlockSpec((1, 3 * E), lambda b: (0, 0)),
            pl.BlockSpec((E, E), lambda b: (0, 0)),
            pl.BlockSpec((1, E), lambda b: (0, 0)),
            pl.BlockSpec((1, E), lambda b: (0, 0)),
            pl.BlockSpec((1, E), lambda b: (0, 0)),
        ],
        out_specs=pl.BlockSpec((1, Sg, E), lambda b: (b, 0, 0)),
        compiler_params=pltpu.CompilerParams(
            dimension_semantics=("parallel",),
            vmem_limit_bytes=VMEM_LIMIT),
        cost_estimate=pl.CostEstimate(flops=flops, transcendentals=trans,
                                      bytes_accessed=bytes_accessed),
    )(qkv_all, gen_res, w_in, b_in, w_c_out, b_c_out, ln_g, ln_b)


# -------------- 4. fused FFN + residual + LN2 (tiled, accumulated) -----------

def _ffn_ln_kernel(x_ref, w1_ref, b1_ref, w2_ref, b2_ref, g_ref, beta_ref,
                   o_ref, acc_ref, *, eps):
    f = pl.program_id(1)

    @pl.when(f == 0)
    def _():
        acc_ref[...] = jnp.zeros_like(acc_ref)

    x = x_ref[...]
    h = jnp.dot(x, w1_ref[...], preferred_element_type=jnp.float32) \
        + b1_ref[...].astype(jnp.float32)
    h = jnp.maximum(h, 0.0)                    # relu (module default activation)
    acc_ref[...] += jnp.dot(h.astype(w2_ref.dtype), w2_ref[...],
                            preferred_element_type=jnp.float32)

    @pl.when(f == pl.num_programs(1) - 1)
    def _():
        # residual + LayerNorm2 epilogue
        y = acc_ref[...] + b2_ref[...].astype(jnp.float32) + x_ref[...].astype(jnp.float32)
        mu = jnp.mean(y, axis=-1, keepdims=True)
        var = jnp.mean((y - mu) ** 2, axis=-1, keepdims=True)
        yn = (y - mu) * jax.lax.rsqrt(var + eps)
        o_ref[...] = (yn * g_ref[...].astype(jnp.float32)
                      + beta_ref[...].astype(jnp.float32)).astype(o_ref.dtype)


def ffn_ln_pallas(x2d, w1, b1, w2, b2, ln_g, ln_b, *, eps,
                  tm_target=256, tf_target=512):
    M, E = x2d.shape
    F = w1.shape[1]
    tm = _pick_tile(M, tm_target, 8)
    tf = _pick_tile(F, tf_target, 128)
    flops = 4 * M * E * F
    bytes_accessed = (2 * M * E + 2 * E * F + F + 3 * E) * x2d.dtype.itemsize
    return pl.pallas_call(
        partial(_ffn_ln_kernel, eps=eps),
        out_shape=jax.ShapeDtypeStruct((M, E), x2d.dtype),
        grid=(M // tm, F // tf),
        in_specs=[
            pl.BlockSpec((tm, E), lambda m, f: (m, 0)),
            pl.BlockSpec((E, tf), lambda m, f: (0, f)),
            pl.BlockSpec((1, tf), lambda m, f: (0, f)),
            pl.BlockSpec((tf, E), lambda m, f: (f, 0)),
            pl.BlockSpec((1, E), lambda m, f: (0, 0)),
            pl.BlockSpec((1, E), lambda m, f: (0, 0)),
            pl.BlockSpec((1, E), lambda m, f: (0, 0)),
        ],
        out_specs=pl.BlockSpec((tm, E), lambda m, f: (m, 0)),
        scratch_shapes=[pltpu.VMEM((tm, E), jnp.float32)],
        compiler_params=pltpu.CompilerParams(
            dimension_semantics=("parallel", "arbitrary"),
            vmem_limit_bytes=VMEM_LIMIT),
        cost_estimate=pl.CostEstimate(flops=flops, transcendentals=0,
                                      bytes_accessed=bytes_accessed),
    )(x2d, w1, b1, w2, b2, ln_g, ln_b)


# ------------------------------ layer wrapper --------------------------------

def init_params(key, d_model, nhead, dff):
    ks = jax.random.split(key, 12)
    s = 0.02
    n = lambda k, shape: (jax.random.normal(k, shape, jnp.float32) * s)
    p = {
        # FlashscGPTMHA.Wqkv / out_proj
        'wqkv': n(ks[0], (d_model, 3 * d_model)), 'bqkv': n(ks[1], (1, 3 * d_model)),
        'w_out': n(ks[2], (d_model, d_model)), 'b_out': n(ks[3], (1, d_model)),
        # cross_attn (nn.MultiheadAttention) in_proj (q|k|v) and its out_proj
        'w_in_proj': n(ks[4], (d_model, 3 * d_model)), 'b_in_proj': n(ks[5], (1, 3 * d_model)),
        'w_c_out': n(ks[6], (d_model, d_model)), 'b_c_out': n(ks[7], (1, d_model)),
        # feed-forward
        'w1': n(ks[8], (d_model, dff)), 'b1': n(ks[9], (1, dff)),
        'w2': n(ks[10], (dff, d_model)), 'b2': n(ks[11], (1, d_model)),
        # layer norms
        'ln1_g': jnp.ones((1, d_model), jnp.float32), 'ln1_b': jnp.zeros((1, d_model), jnp.float32),
        'ln2_g': jnp.ones((1, d_model), jnp.float32), 'ln2_b': jnp.zeros((1, d_model), jnp.float32),
    }
    return p


def flash_scgpt_layer(pcpt, gen, p, nhead, eps=1e-5):
    """FlashscGPTLayer forward, norm_scheme='post' (module default); dropouts identity."""
    # TODO(synk): key_padding_mask support omitted — the layer's default path (mask=None)
    # is implemented.
    B, Sp, E = pcpt.shape
    Sg = gen.shape[1]
    S_all = Sp + Sg
    H = nhead
    Dh = E // H

    # (1) shared-weight QKV projection on pcpt||gen rows in ONE call (weights streamed once)
    x_all = jnp.concatenate([pcpt, gen], axis=1)                   # (B, Sp+Sg, E)
    qkv_all = linear_pallas(x_all.reshape(B * S_all, E), p['wqkv'], p['bqkv'])
    qkv_all = qkv_all.reshape(B, S_all, 3 * E)

    # (2) pcpt branch: self-attn + out_proj + residual + LN1 fused
    pcpt_f = pcpt_attn_pallas(qkv_all, pcpt, p['w_out'], p['b_out'],
                              p['ln1_g'], p['ln1_b'], Sp=Sp, H=H, Dh=Dh, eps=eps)

    # (3) gen branch: cross-attn (in-proj + attn + out_proj) + residual + LN1 fused
    gen_f = gen_attn_pallas(qkv_all, gen, p['w_in_proj'], p['b_in_proj'],
                            p['w_c_out'], p['b_c_out'], p['ln1_g'], p['ln1_b'],
                            Sp=Sp, Sg=Sg, H=H, Dh=Dh, eps=eps)

    # (4) shared-weight FFN + residual + LN2 on pcpt||gen rows in ONE call
    xf = jnp.concatenate([pcpt_f.reshape(B * Sp, E), gen_f.reshape(B * Sg, E)], axis=0)
    out = ffn_ln_pallas(xf, p['w1'], p['b1'], p['w2'], p['b2'],
                        p['ln2_g'], p['ln2_b'], eps=eps)
    pcpt_out = out[:B * Sp].reshape(B, Sp, E)
    gen_out = out[B * Sp:].reshape(B, Sg, E)
    return pcpt_out, gen_out


# ---------------------------------- main ------------------------------------

if __name__ == "__main__":
    d_model, nhead, dff = 32, 4, 64            # head_dim = 8 (toy-only; production wants >=64)
    B, Sp, Sg = 2, 8, 4

    key = jax.random.PRNGKey(0)
    kp, kg, kw = jax.random.split(key, 3)
    pcpt_total_embs = jax.random.normal(kp, (B, Sp, d_model), jnp.float32)
    gen_total_embs = jax.random.normal(kg, (B, Sg, d_model), jnp.float32)
    params = init_params(kw, d_model, nhead, dff)

    layer = jax.jit(partial(flash_scgpt_layer, nhead=nhead))
    pcpt_out, gen_out = layer(pcpt_total_embs, gen_total_embs, params)
    jax.block_until_ready((pcpt_out, gen_out))

    assert pcpt_out.shape == (B, Sp, d_model)
    assert gen_out.shape == (B, Sg, d_model)
    assert bool(jnp.all(jnp.isfinite(pcpt_out))) and bool(jnp.all(jnp.isfinite(gen_out)))
    print("KERNEL_OK")
</pallas_src>

<mosaic_0001>
module attributes {stable_mosaic.version = 11 : i64} {
  func.func @_linear_kernel(%arg0: i32, %arg1: i32, %arg2: memref<24x32xf32, #tpu.memory_space<vmem>>, %arg3: memref<32x96xf32, #tpu.memory_space<vmem>>, %arg4: memref<1x96xf32, #tpu.memory_space<vmem>>, %arg5: memref<24x96xf32, #tpu.memory_space<vmem>>) attributes {dimension_semantics = [#tpu.dimension_semantics<parallel>, #tpu.dimension_semantics<parallel>], iteration_bounds = array<i64: 1, 1>, scalar_prefetch = 0 : i64, scratch_operands = 0 : i64, tpu.core_type = #tpu.core_type<tc>, window_params = [{transform_indices = @transform_0, window_bounds = array<i64: 24, 32>}, {transform_indices = @transform_1, window_bounds = array<i64: 32, 96>}, {transform_indices = @transform_2, window_bounds = array<i64: 1, 96>}, {transform_indices = @transform_3, window_bounds = array<i64: 24, 96>}]} {
    %c0 = arith.constant 0 : index
    %c0_0 = arith.constant 0 : index
    %0 = vector.load %arg2[%c0, %c0_0] : memref<24x32xf32, #tpu.memory_space<vmem>>, vector<24x32xf32>
    %c0_1 = arith.constant 0 : index
    %c0_2 = arith.constant 0 : index
    %1 = vector.load %arg3[%c0_1, %c0_2] : memref<32x96xf32, #tpu.memory_space<vmem>>, vector<32x96xf32>
    %cst = arith.constant dense<0.000000e+00> : vector<24x96xf32>
    %2 = tpu.matmul %0, %1, %cst {dimension_numbers = #tpu.dot_dimension_numbers<[1], [0], [0], [1], [0, 0, 1, 1], [], []>} : vector<24x32xf32>, vector<32x96xf32>, vector<24x96xf32> -> vector<24x96xf32>
    %c0_3 = arith.constant 0 : index
    %c0_4 = arith.constant 0 : index
    %3 = vector.load %arg4[%c0_3, %c0_4] : memref<1x96xf32, #tpu.memory_space<vmem>>, vector<1x96xf32>
    %4 = vector.broadcast %3 : vector<1x96xf32> to vector<24x96xf32>
    %5 = arith.addf %2, %4 : vector<24x96xf32>
    %c0_5 = arith.constant 0 : index
    %c0_6 = arith.constant 0 : index
    %6 = vector.load %arg5[%c0_5, %c0_6] : memref<24x96xf32, #tpu.memory_space<vmem>>, vector<24x96xf32>
    tpu.vector_store %arg5[%c0_5, %c0_6], %5 {strides = array<i32>} : memref<24x96xf32, #tpu.memory_space<vmem>>, vector<24x96xf32>,
    return
  }
  func.func @transform_0(%arg0: i32, %arg1: i32) -> (i32, i32) {
    %c0_i32 = arith.constant 0 : i32
    %c0_i32_0 = arith.constant 0 : i32
    return %arg0, %c0_i32 : i32, i32
  }
  func.func @transform_1(%arg0: i32, %arg1: i32) -> (i32, i32) {
    %c0_i32 = arith.constant 0 : i32
    %c0_i32_0 = arith.constant 0 : i32
    return %c0_i32, %arg1 : i32, i32
  }
  func.func @transform_2(%arg0: i32, %arg1: i32) -> (i32, i32) {
    %c0_i32 = arith.constant 0 : i32
    %c0_i32_0 = arith.constant 0 : i32
    return %c0_i32, %arg1 : i32, i32
  }
  func.func @transform_3(%arg0: i32, %arg1: i32) -> (i32, i32) {
    %c0_i32 = arith.constant 0 : i32
    return %arg0, %arg1 : i32, i32
  }
}

module attributes {stable_mosaic.version = 11 : i64} {
  func.func @_gen_attn_kernel(%arg0: i32, %arg1: memref<1x12x96xf32, #tpu.memory_space<vmem>>, %arg2: memref<1x4x32xf32, #tpu.memory_space<vmem>>, %arg3: memref<32x96xf32, #tpu.memory_space<vmem>>, %arg4: memref<1x96xf32, #tpu.memory_space<vmem>>, %arg5: memref<32x32xf32, #tpu.memory_space<vmem>>, %arg6: memref<1x32xf32, #tpu.memory_space<vmem>>, %arg7: memref<1x32xf32, #tpu.memory_space<vmem>>, %arg8: memref<1x32xf32, #tpu.memory_space<vmem>>, %arg9: memref<1x4x32xf32, #tpu.memory_space<vmem>>) attributes {dimension_semantics = [#tpu.dimension_semantics<parallel>], iteration_bounds = array<i64: 2>, scalar_prefetch = 0 : i64, scratch_operands = 0 : i64, tpu.core_type = #tpu.core_type<tc>, window_params = [{transform_indices = @transform_0, window_bounds = array<i64: 1, 12, 96>}, {transform_indices = @transform_1, window_bounds = array<i64: 1, 4, 32>}, {pipeline_mode = #tpu.pipeline_mode<synchronous>, transform_indices = @transform_2, window_bounds = array<i64: 32, 96>}, {pipeline_mode = #tpu.pipeline_mode<synchronous>, transform_indices = @transform_3, window_bounds = array<i64: 1, 96>}, {pipeline_mode = #tpu.pipeline_mode<synchronous>, transform_indices = @transform_4, window_bounds = array<i64: 32, 32>}, {pipeline_mode = #tpu.pipeline_mode<synchronous>, transform_indices = @transform_5, window_bounds = array<i64: 1, 32>}, {pipeline_mode = #tpu.pipeline_mode<synchronous>, transform_indices = @transform_6, window_bounds = array<i64: 1, 32>}, {pipeline_mode = #tpu.pipeline_mode<synchronous>, transform_indices = @transform_7, window_bounds = array<i64: 1, 32>}, {transform_indices = @transform_8, window_bounds = array<i64: 1, 4, 32>}]} {
    %c0 = arith.constant 0 : index
    %c0_0 = arith.constant 0 : index
    %c0_1 = arith.constant 0 : index
    %0 = vector.load %arg1[%c0, %c0_0, %c0_1] : memref<1x12x96xf32, #tpu.memory_space<vmem>>, vector<1x12x96xf32>
    %1 = vector.shape_cast %0 : vector<1x12x96xf32> to vector<12x96xf32>
    %2 = vector.extract_strided_slice %1 {offsets = [8, 0], sizes = [4, 32], strides = [1, 1]} : vector<12x96xf32> to vector<4x32xf32>
    %3 = vector.extract_strided_slice %1 {offsets = [0, 32], sizes = [12, 32], strides = [1, 1]} : vector<12x96xf32> to vector<12x32xf32>
    %4 = vector.extract_strided_slice %1 {offsets = [0, 64], sizes = [12, 32], strides = [1, 1]} : vector<12x96xf32> to vector<12x32xf32>
    %c0_2 = arith.constant 0 : index
    %c0_3 = arith.constant 0 : index
    %5 = vector.load %arg3[%c0_2, %c0_3] : memref<32x96xf32, #tpu.memory_space<vmem>>, vector<32x96xf32>
    %c0_4 = arith.constant 0 : index
    %c0_5 = arith.constant 0 : index
    %6 = vector.load %arg4[%c0_4, %c0_5] : memref<1x96xf32, #tpu.memory_space<vmem>>, vector<1x96xf32>
    %7 = vector.extract_strided_slice %5 {offsets = [0, 0], sizes = [32, 32], strides = [1, 1]} : vector<32x96xf32> to vector<32x32xf32>
    %cst = arith.constant dense<0.000000e+00> : vector<4x32xf32>
    %8 = tpu.matmul %2, %7, %cst {dimension_numbers = #tpu.dot_dimension_numbers<[1], [0], [0], [1], [0, 0, 1, 1], [], []>} : vector<4x32xf32>, vector<32x32xf32>, vector<4x32xf32> -> vector<4x32xf32>
    %9 = vector.extract_strided_slice %6 {offsets = [0, 0], sizes = [1, 32], strides = [1, 1]} : vector<1x96xf32> to vector<1x32xf32>
    %10 = vector.broadcast %9 : vector<1x32xf32> to vector<4x32xf32>
    %11 = arith.addf %8, %10 : vector<4x32xf32>
    %12 = vector.extract_strided_slice %5 {offsets = [0, 32], sizes = [32, 32], strides = [1, 1]} : vector<32x96xf32> to vector<32x32xf32>
    %cst_6 = arith.constant dense<0.000000e+00> : vector<12x32xf32>
    %13 = tpu.matmul %3, %12, %cst_6 {dimension_numbers = #tpu.dot_dimension_numbers<[1], [0], [0], [1], [0, 0, 1, 1], [], []>} : vector<12x32xf32>, vector<32x32xf32>, vector<12x32xf32> -> vector<12x32xf32>
    %14 = vector.extract_strided_slice %6 {offsets = [0, 32], sizes = [1, 32], strides = [1, 1]} : vector<1x96xf32> to vector<1x32xf32>
    %15 = vector.broadcast %14 : vector<1x32xf32> to vector<12x32xf32>
    %16 = arith.addf %13, %15 : vector<12x32xf32>
    %17 = vector.extract_strided_slice %5 {offsets = [0, 64], sizes = [32, 32], strides = [1, 1]} : vector<32x96xf32> to vector<32x32xf32>
    %cst_7 = arith.constant dense<0.000000e+00> : vector<12x32xf32>
    %18 = tpu.matmul %4, %17, %cst_7 {dimension_numbers = #tpu.dot_dimension_numbers<[1], [0], [0], [1], [0, 0, 1, 1], [], []>} : vector<12x32xf32>, vector<32x32xf32>, vector<12x32xf32> -> vector<12x32xf32>
    %19 = vector.extract_strided_slice %6 {offsets = [0, 64], sizes = [1, 32], strides = [1, 1]} : vector<1x96xf32> to vector<1x32xf32>
    %20 = vector.broadcast %19 : vector<1x32xf32> to vector<12x32xf32>
    %21 = arith.addf %18, %20 : vector<12x32xf32>
    %cst_8 = arith.constant 0.353553385 : f32
    %22 = vector.broadcast %cst_8 : f32 to vector<4x32xf32>
    %23 = arith.mulf %11, %22 : vector<4x32xf32>
    %24 = tpu.iota {dimensions = array<i32: 0>} : vector<4x12xi32>
    %25 = tpu.iota {dimensions = array<i32: 1>} : vector<4x12xi32>
    %c8_i32 = arith.constant 8 : i32
    %26 = vector.broadcast %c8_i32 : i32 to vector<4x12xi32>
    %27 = arith.cmpi slt, %25, %26 : vector<4x12xi32>
    %c8_i32_9 = arith.constant 8 : i32
    %28 = vector.broadcast %c8_i32_9 : i32 to vector<4x12xi32>
    %29 = arith.addi %24, %28 : vector<4x12xi32>
    %30 = arith.cmpi eq, %25, %29 : vector<4x12xi32>
    %31 = arith.ori %27, %30 : vector<4x12xi1>
    %cst_10 = arith.constant 0.000000e+00 : f32
    %cst_11 = arith.constant -1.000000e+30 : f32
    %32 = vector.broadcast %cst_10 : f32 to vector<4x12xf32>
    %33 = vector.broadcast %cst_11 : f32 to vector<4x12xf32>
    %34 = arith.select %31, %32, %33 : vector<4x12xi1>, vector<4x12xf32>
    %c0_12 = arith.constant 0 : index
    %c0_13 = arith.constant 0 : index
    %35 = vector.load %arg5[%c0_12, %c0_13] : memref<32x32xf32, #tpu.memory_space<vmem>>, vector<32x32xf32>
    %c0_14 = arith.constant 0 : index
    %c0_15 = arith.constant 0 : index
    %36 = vector.load %arg6[%c0_14, %c0_15] : memref<1x32xf32, #tpu.memory_space<vmem>>, vector<1x32xf32>
    %37 = vector.extract_strided_slice %23 {offsets = [0, 0], sizes = [4, 8], strides = [1, 1]} : vector<4x32xf32> to vector<4x8xf32>
    %38 = vector.extract_strided_slice %16 {offsets = [0, 0], sizes = [12, 8], strides = [1, 1]} : vector<12x32xf32> to vector<12x8xf32>
    %39 = vector.extract_strided_slice %21 {offsets = [0, 0], sizes = [12, 8], strides = [1, 1]} : vector<12x32xf32> to vector<12x8xf32>
    %cst_16 = arith.constant dense<0.000000e+00> : vector<4x12xf32>
    %40 = tpu.matmul %37, %38, %cst_16 {dimension_numbers = #tpu.dot_dimension_numbers<[1], [1], [0], [0], [0, 0, 1, 0], [], []>} : vector<4x8xf32>, vector<12x8xf32>, vector<4x12xf32> -> vector<4x12xf32>
    %41 = arith.addf %40, %34 : vector<4x12xf32>
    %cst_17 = arith.constant dense<0xFF800000> : vector<4xf32>
    %42 = vector.multi_reduction <maximumf>, %41, %cst_17 [1] : vector<4x12xf32> to vector<4xf32>
    %43 = vector.shape_cast %42 : vector<4xf32> to vector<4x1xf32>
    %44 = vector.broadcast %43 : vector<4x1xf32> to vector<4x12xf32>
    %45 = arith.subf %41, %44 : vector<4x12xf32>
    %46 = math.exp %45 : vector<4x12xf32>
    %cst_18 = arith.constant dense<0.000000e+00> : vector<4xf32>
    %47 = vector.multi_reduction <add>, %46, %cst_18 [1] : vector<4x12xf32> to vector<4xf32>
    %48 = vector.shape_cast %47 : vector<4xf32> to vector<4x1xf32>
    %49 = tpu.reciprocal %48 {approx = true} : vector<4x1xf32> -> vector<4x1xf32>
    %50 = vector.broadcast %49 : vector<4x1xf32> to vector<4x12xf32>
    %51 = arith.mulf %46, %50 : vector<4x12xf32>
    %cst_19 = arith.constant dense<0.000000e+00> : vector<4x8xf32>
    %52 = tpu.matmul %51, %39, %cst_19 {dimension_numbers = #tpu.dot_dimension_numbers<[1], [0], [0], [1], [0, 0, 1, 1], [], []>} : vector<4x12xf32>, vector<12x8xf32>, vector<4x8xf32> -> vector<4x8xf32>
    %53 = vector.extract_strided_slice %35 {offsets = [0, 0], sizes = [8, 32], strides = [1, 1]} : vector<32x32xf32> to vector<8x32xf32>
    %cst_20 = arith.constant dense<0.000000e+00> : vector<4x32xf32>
    %54 = tpu.matmul %52, %53, %cst_20 {dimension_numbers = #tpu.dot_dimension_numbers<[1], [0], [0], [1], [0, 0, 1, 1], [], []>} : vector<4x8xf32>, vector<8x32xf32>, vector<4x32xf32> -> vector<4x32xf32>
    %55 = vector.broadcast %36 : vector<1x32xf32> to vector<4x32xf32>
    %56 = arith.addf %55, %54 : vector<4x32xf32>
    %57 = vector.extract_strided_slice %23 {offsets = [0, 8], sizes = [4, 8], strides = [1, 1]} : vector<4x32xf32> to vector<4x8xf32>
    %58 = vector.extract_strided_slice %16 {offsets = [0, 8], sizes = [12, 8], strides = [1, 1]} : vector<12x32xf32> to vector<12x8xf32>
    %59 = vector.extract_strided_slice %21 {offsets = [0, 8], sizes = [12, 8], strides = [1, 1]} : vector<12x32xf32> to vector<12x8xf32>
    %cst_21 = arith.constant dense<0.000000e+00> : vector<4x12xf32>
    %60 = tpu.matmul %57, %58, %cst_21 {dimension_numbers = #tpu.dot_dimension_numbers<[1], [1], [0], [0], [0, 0, 1, 0], [], []>} : vector<4x8xf32>, vector<12x8xf32>, vector<4x12xf32> -> vector<4x12xf32>
    %61 = arith.addf %60, %34 : vector<4x12xf32>
    %cst_22 = arith.constant dense<0xFF800000> : vector<4xf32>
    %62 = vector.multi_reduction <maximumf>, %61, %cst_22 [1] : vector<4x12xf32> to vector<4xf32>
    %63 = vector.shape_cast %62 : vector<4xf32> to vector<4x1xf32>
    %64 = vector.broadcast %63 : vector<4x1xf32> to vector<4x12xf32>
    %65 = arith.subf %61, %64 : vector<4x12xf32>
    %66 = math.exp %65 : vector<4x12xf32>
    %cst_23 = arith.constant dense<0.000000e+00> : vector<4xf32>
    %67 = vector.multi_reduction <add>, %66, %cst_23 [1] : vector<4x12xf32> to vector<4xf32>
    %68 = vector.shape_cast %67 : vector<4xf32> to vector<4x1xf32>
    %69 = tpu.reciprocal %68 {approx = true} : vector<4x1xf32> -> vector<4x1xf32>
    %70 = vector.broadcast %69 : vector<4x1xf32> to vector<4x12xf32>
    %71 = arith.mulf %66, %70 : vector<4x12xf32>
    %cst_24 = arith.constant dense<0.000000e+00> : vector<4x8xf32>
    %72 = tpu.matmul %71, %59, %cst_24 {dimension_numbers = #tpu.dot_dimension_numbers<[1], [0], [0], [1], [0, 0, 1, 1], [], []>} : vector<4x12xf32>, vector<12x8xf32>, vector<4x8xf32> -> vector<4x8xf32>
    %73 = vector.extract_strided_slice %35 {offsets = [8, 0], sizes = [8, 32], strides = [1, 1]} : vector<32x32xf32> to vector<8x32xf32>
    %cst_25 = arith.constant dense<0.000000e+00> : vector<4x32xf32>
    %74 = tpu.matmul %72, %73, %cst_25 {dimension_numbers = #tpu.dot_dimension_numbers<[1], [0], [0], [1], [0, 0, 1, 1], [], []>} : vector<4x8xf32>, vector<8x32xf32>, vector<4x32xf32> -> vector<4x32xf32>
    %75 = arith.addf %56, %74 : vector<4x32xf32>
    %76 = vector.extract_strided_slice %23 {offsets = [0, 16], sizes = [4, 8], strides = [1, 1]} : vector<4x32xf32> to vector<4x8xf32>
    %77 = vector.extract_strided_slice %16 {offsets = [0, 16], sizes = [12, 8], strides = [1, 1]} : vector<12x32xf32> to vector<12x8xf32>
    %78 = vector.extract_strided_slice %21 {offsets = [0, 16], sizes = [12, 8], strides = [1, 1]} : vector<12x32xf32> to vector<12x8xf32>
    %cst_26 = arith.constant dense<0.000000e+00> : vector<4x12xf32>
    %79 = tpu.matmul %76, %77, %cst_26 {dimension_numbers = #tpu.dot_dimension_numbers<[1], [1], [0], [0], [0, 0, 1, 0], [], []>} : vector<4x8xf32>, vector<12x8xf32>, vector<4x12xf32> -> vector<4x12xf32>
    %80 = arith.addf %79, %34 : vector<4x12xf32>
    %cst_27 = arith.constant dense<0xFF800000> : vector<4xf32>
    %81 = vector.multi_reduction <maximumf>, %80, %cst_27 [1] : vector<4x12xf32> to vector<4xf32>
    %82 = vector.shape_cast %81 : vector<4xf32> to vector<4x1xf32>
    %83 = vector.broadcast %82 : vector<4x1xf32> to vector<4x12xf32>
    %84 = arith.subf %80, %83 : vector<4x12xf32>
    %85 = math.exp %84 : vector<4x12xf32>
    %cst_28 = arith.constant dense<0.000000e+00> : vector<4xf32>
    %86 = vector.multi_reduction <add>, %85, %cst_28 [1] : vector<4x12xf32> to vector<4xf32>
    %87 = vector.shape_cast %86 : vector<4xf32> to vector<4x1xf32>
    %88 = tpu.reciprocal %87 {approx = true} : vector<4x1xf32> -> vector<4x1xf32>
    %89 = vector.broadcast %88 : vector<4x1xf32> to vector<4x12xf32>
    %90 = arith.mulf %85, %89 : vector<4x12xf32>
    %cst_29 = arith.constant dense<0.000000e+00> : vector<4x8xf32>
    %91 = tpu.matmul %90, %78, %cst_29 {dimension_numbers = #tpu.dot_dimension_numbers<[1], [0], [0], [1], [0, 0, 1, 1], [], []>} : vector<4x12xf32>, vector<12x8xf32>, vector<4x8xf32> -> vector<4x8xf32>
    %92 = vector.extract_strided_slice %35 {offsets = [16, 0], sizes = [8, 32], strides = [1, 1]} : vector<32x32xf32> to vector<8x32xf32>
    %cst_30 = arith.constant dense<0.000000e+00> : vector<4x32xf32>
    %93 = tpu.matmul %91, %92, %cst_30 {dimension_numbers = #tpu.dot_dimension_numbers<[1], [0], [0], [1], [0, 0, 1, 1], [], []>} : vector<4x8xf32>, vector<8x32xf32>, vector<4x32xf32> -> vector<4x32xf32>
    %94 = arith.addf %75, %93 : vector<4x32xf32>
    %95 = vector.extract_strided_slice %23 {offsets = [0, 24], sizes = [4, 8], strides = [1, 1]} : vector<4x32xf32> to vector<4x8xf32>
    %96 = vector.extract_strided_slice %16 {offsets = [0, 24], sizes = [12, 8], strides = [1, 1]} : vector<12x32xf32> to vector<12x8xf32>
    %97 = vector.extract_strided_slice %21 {offsets = [0, 24], sizes = [12, 8], strides = [1, 1]} : vector<12x32xf32> to vector<12x8xf32>
    %cst_31 = arith.constant dense<0.000000e+00> : vector<4x12xf32>
    %98 = tpu.matmul %95, %96, %cst_31 {dimension_numbers = #tpu.dot_dimension_numbers<[1], [1], [0], [0], [0, 0, 1, 0], [], []>} : vector<4x8xf32>, vector<12x8xf32>, vector<4x12xf32> -> vector<4x12xf32>
    %99 = arith.addf %98, %34 : vector<4x12xf32>
    %cst_32 = arith.constant dense<0xFF800000> : vector<4xf32>
    %100 = vector.multi_reduction <maximumf>, %99, %cst_32 [1] : vector<4x12xf32> to vector<4xf32>
    %101 = vector.shape_cast %100 : vector<4xf32> to vector<4x1xf32>
    %102 = vector.broadcast %101 : vector<4x1xf32> to vector<4x12xf32>
    %103 = arith.subf %99, %102 : vector<4x12xf32>
    %104 = math.exp %103 : vector<4x12xf32>
    %cst_33 = arith.constant dense<0.000000e+00> : vector<4xf32>
    %105 = vector.multi_reduction <add>, %104, %cst_33 [1] : vector<4x12xf32> to vector<4xf32>
    %106 = vector.shape_cast %105 : vector<4xf32> to vector<4x1xf32>
    %107 = tpu.reciprocal %106 {approx = true} : vector<4x1xf32> -> vector<4x1xf32>
    %108 = vector.broadcast %107 : vector<4x1xf32> to vector<4x12xf32>
    %109 = arith.mulf %104, %108 : vector<4x12xf32>
    %cst_34 = arith.constant dense<0.000000e+00> : vector<4x8xf32>
    %110 = tpu.matmul %109, %97, %cst_34 {dimension_numbers = #tpu.dot_dimension_numbers<[1], [0], [0], [1], [0, 0, 1, 1], [], []>} : vector<4x12xf32>, vector<12x8xf32>, vector<4x8xf32> -> vector<4x8xf32>
    %111 = vector.extract_strided_slice %35 {offsets = [24, 0], sizes = [8, 32], strides = [1, 1]} : vector<32x32xf32> to vector<8x32xf32>
    %cst_35 = arith.constant dense<0.000000e+00> : vector<4x32xf32>
    %112 = tpu.matmul %110, %111, %cst_35 {dimension_numbers = #tpu.dot_dimension_numbers<[1], [0], [0], [1], [0, 0, 1, 1], [], []>} : vector<4x8xf32>, vector<8x32xf32>, vector<4x32xf32> -> vector<4x32xf32>
    %113 = arith.addf %94, %112 : vector<4x32xf32>
    %c0_36 = arith.constant 0 : index
    %c0_37 = arith.constant 0 : index
    %c0_38 = arith.constant 0 : index
    %114 = vector.load %arg2[%c0_36, %c0_37, %c0_38] : memref<1x4x32xf32, #tpu.memory_space<vmem>>, vector<1x4x32xf32>
    %115 = vector.shape_cast %114 : vector<1x4x32xf32> to vector<4x32xf32>
    %116 = arith.addf %113, %115 : vector<4x32xf32>
    %cst_39 = arith.constant dense<0.000000e+00> : vector<4xf32>
    %117 = vector.multi_reduction <add>, %116, %cst_39 [1] : vector<4x32xf32> to vector<4xf32>
    %118 = vector.shape_cast %117 : vector<4xf32> to vector<4x1xf32>
    %cst_40 = arith.constant 3.200000e+01 : f32
    %119 = vector.broadcast %cst_40 : f32 to vector<4x1xf32>
    %120 = arith.divf %118, %119 : vector<4x1xf32>
    %121 = vector.broadcast %120 : vector<4x1xf32> to vector<4x32xf32>
    %122 = arith.subf %116, %121 : vector<4x32xf32>
    %123 = arith.mulf %122, %122 : vector<4x32xf32>
    %cst_41 = arith.constant dense<0.000000e+00> : vector<4xf32>
    %124 = vector.multi_reduction <add>, %123, %cst_41 [1] : vector<4x32xf32> to vector<4xf32>
    %125 = vector.shape_cast %124 : vector<4xf32> to vector<4x1xf32>
    %cst_42 = arith.constant 3.200000e+01 : f32
    %126 = vector.broadcast %cst_42 : f32 to vector<4x1xf32>
    %127 = arith.divf %125, %126 : vector<4x1xf32>
    %128 = vector.broadcast %120 : vector<4x1xf32> to vector<4x32xf32>
    %129 = arith.subf %116, %128 : vector<4x32xf32>
    %cst_43 = arith.constant 9.99999974E-6 : f32
    %130 = vector.broadcast %cst_43 : f32 to vector<4x1xf32>
    %131 = arith.addf %127, %130 : vector<4x1xf32>
    %132 = math.rsqrt %131 : vector<4x1xf32>
    %133 = vector.broadcast %132 : vector<4x1xf32> to vector<4x32xf32>
    %134 = arith.mulf %129, %133 : vector<4x32xf32>
    %c0_44 = arith.constant 0 : index
    %c0_45 = arith.constant 0 : index
    %135 = vector.load %arg7[%c0_44, %c0_45] : memref<1x32xf32, #tpu.memory_space<vmem>>, vector<1x32xf32>
    %136 = vector.broadcast %135 : vector<1x32xf32> to vector<4x32xf32>
    %137 = arith.mulf %134, %136 : vector<4x32xf32>
    %c0_46 = arith.constant 0 : index
    %c0_47 = arith.constant 0 : index
    %138 = vector.load %arg8[%c0_46, %c0_47] : memref<1x32xf32, #tpu.memory_space<vmem>>, vector<1x32xf32>
    %139 = vector.broadcast %138 : vector<1x32xf32> to vector<4x32xf32>
    %140 = arith.addf %137, %139 : vector<4x32xf32>
    %c0_48 = arith.constant 0 : index
    %c0_49 = arith.constant 0 : index
    %c0_50 = arith.constant 0 : index
    %141 = vector.load %arg9[%c0_48, %c0_49, %c0_50] : memref<1x4x32xf32, #tpu.memory_space<vmem>>, vector<1x4x32xf32>
    %142 = vector.shape_cast %141 : vector<1x4x32xf32> to vector<4x32xf32>
    %143 = vector.shape_cast %140 : vector<4x32xf32> to vector<1x4x32xf32>
    tpu.vector_store %arg9[%c0_48, %c0_49, %c0_50], %143 {strides = array<i32>} : memref<1x4x32xf32, #tpu.memory_space<vmem>>, vector<1x4x32xf32>,
    return
  }
  func.func @transform_0(%arg0: i32) -> (i32, i32, i32) {
    %c0_i32 = arith.constant 0 : i32
    %c0_i32_0 = arith.constant 0 : i32
    %c0_i32_1 = arith.constant 0 : i32
    return %arg0, %c0_i32, %c0_i32_0 : i32, i32, i32
  }
  func.func @transform_1(%arg0: i32) -> (i32, i32, i32) {
    %c0_i32 = arith.constant 0 : i32
    %c0_i32_0 = arith.constant 0 : i32
    %c0_i32_1 = arith.constant 0 : i32
    return %arg0, %c0_i32, %c0_i32_0 : i32, i32, i32
  }
  func.func @transform_2(%arg0: i32) -> (i32, i32) {
    %c0_i32 = arith.constant 0 : i32
    %c0_i32_0 = arith.constant 0 : i32
    %c0_i32_1 = arith.constant 0 : i32
    return %c0_i32, %c0_i32_0 : i32, i32
  }
  func.func @transform_3(%arg0: i32) -> (i32, i32) {
    %c0_i32 = arith.constant 0 : i32
    %c0_i32_0 = arith.constant 0 : i32
    %c0_i32_1 = arith.constant 0 : i32
    return %c0_i32, %c0_i32_0 : i32, i32
  }
  func.func @transform_4(%arg0: i32) -> (i32, i32) {
    %c0_i32 = arith.constant 0 : i32
    %c0_i32_0 = arith.constant 0 : i32
    %c0_i32_1 = arith.constant 0 : i32
    return %c0_i32, %c0_i32_0 : i32, i32
  }
  func.func @transform_5(%arg0: i32) -> (i32, i32) {
    %c0_i32 = arith.constant 0 : i32
    %c0_i32_0 = arith.constant 0 : i32
    %c0_i32_1 = arith.constant 0 : i32
    return %c0_i32, %c0_i32_0 : i32, i32
  }
  func.func @transform_6(%arg0: i32) -> (i32, i32) {
    %c0_i32 = arith.constant 0 : i32
    %c0_i32_0 = arith.constant 0 : i32
    %c0_i32_1 = arith.constant 0 : i32
    return %c0_i32, %c0_i32_0 : i32, i32
  }
  func.func @transform_7(%arg0: i32) -> (i32, i32) {
    %c0_i32 = arith.constant 0 : i32
    %c0_i32_0 = arith.constant 0 : i32
    %c0_i32_1 = arith.constant 0 : i32
    return %c0_i32, %c0_i32_0 : i32, i32
  }
  func.func @transform_8(%arg0: i32) -> (i32, i32, i32) {
    %c0_i32 = arith.constant 0 : i32
    %c0_i32_0 = arith.constant 0 : i32
    %c0_i32_1 = arith.constant 0 : i32
    return %arg0, %c0_i32, %c0_i32_0 : i32, i32, i32
  }
}

module attributes {stable_mosaic.version = 11 : i64} {
  func.func @_pcpt_attn_kernel(%arg0: i32, %arg1: memref<1x12x96xf32, #tpu.memory_space<vmem>>, %arg2: memref<1x8x32xf32, #tpu.memory_space<vmem>>, %arg3: memref<32x32xf32, #tpu.memory_space<vmem>>, %arg4: memref<1x32xf32, #tpu.memory_space<vmem>>, %arg5: memref<1x32xf32, #tpu.memory_space<vmem>>, %arg6: memref<1x32xf32, #tpu.memory_space<vmem>>, %arg7: memref<1x8x32xf32, #tpu.memory_space<vmem>>) attributes {dimension_semantics = [#tpu.dimension_semantics<parallel>], iteration_bounds = array<i64: 2>, scalar_prefetch = 0 : i64, scratch_operands = 0 : i64, tpu.core_type = #tpu.core_type<tc>, window_params = [{transform_indices = @transform_0, window_bounds = array<i64: 1, 12, 96>}, {transform_indices = @transform_1, window_bounds = array<i64: 1, 8, 32>}, {pipeline_mode = #tpu.pipeline_mode<synchronous>, transform_indices = @transform_2, window_bounds = array<i64: 32, 32>}, {pipeline_mode = #tpu.pipeline_mode<synchronous>, transform_indices = @transform_3, window_bounds = array<i64: 1, 32>}, {pipeline_mode = #tpu.pipeline_mode<synchronous>, transform_indices = @transform_4, window_bounds = array<i64: 1, 32>}, {pipeline_mode = #tpu.pipeline_mode<synchronous>, transform_indices = @transform_5, window_bounds = array<i64: 1, 32>}, {transform_indices = @transform_6, window_bounds = array<i64: 1, 8, 32>}]} {
    %c0 = arith.constant 0 : index
    %c0_0 = arith.constant 0 : index
    %c0_1 = arith.constant 0 : index
    %0 = vector.load %arg1[%c0, %c0_0, %c0_1] : memref<1x12x96xf32, #tpu.memory_space<vmem>>, vector<1x12x96xf32>
    %1 = vector.shape_cast %0 : vector<1x12x96xf32> to vector<12x96xf32>
    %2 = vector.extract_strided_slice %1 {offsets = [0, 0], sizes = [8, 32], strides = [1, 1]} : vector<12x96xf32> to vector<8x32xf32>
    %3 = vector.extract_strided_slice %1 {offsets = [0, 32], sizes = [8, 32], strides = [1, 1]} : vector<12x96xf32> to vector<8x32xf32>
    %4 = vector.extract_strided_slice %1 {offsets = [0, 64], sizes = [8, 32], strides = [1, 1]} : vector<12x96xf32> to vector<8x32xf32>
    %c0_2 = arith.constant 0 : index
    %c0_3 = arith.constant 0 : index
    %5 = vector.load %arg3[%c0_2, %c0_3] : memref<32x32xf32, #tpu.memory_space<vmem>>, vector<32x32xf32>
    %c0_4 = arith.constant 0 : index
    %c0_5 = arith.constant 0 : index
    %6 = vector.load %arg4[%c0_4, %c0_5] : memref<1x32xf32, #tpu.memory_space<vmem>>, vector<1x32xf32>
    %7 = vector.extract_strided_slice %2 {offsets = [0, 0], sizes = [8, 8], strides = [1, 1]} : vector<8x32xf32> to vector<8x8xf32>
    %cst = arith.constant 0.353553385 : f32
    %8 = vector.broadcast %cst : f32 to vector<8x8xf32>
    %9 = arith.mulf %7, %8 : vector<8x8xf32>
    %10 = vector.extract_strided_slice %3 {offsets = [0, 0], sizes = [8, 8], strides = [1, 1]} : vector<8x32xf32> to vector<8x8xf32>
    %11 = vector.extract_strided_slice %4 {offsets = [0, 0], sizes = [8, 8], strides = [1, 1]} : vector<8x32xf32> to vector<8x8xf32>
    %cst_6 = arith.constant dense<0.000000e+00> : vector<8x8xf32>
    %12 = tpu.matmul %9, %10, %cst_6 {dimension_numbers = #tpu.dot_dimension_numbers<[1], [1], [0], [0], [0, 0, 1, 0], [], []>} : vector<8x8xf32>, vector<8x8xf32>, vector<8x8xf32> -> vector<8x8xf32>
    %cst_7 = arith.constant dense<0xFF800000> : vector<8xf32>
    %13 = vector.multi_reduction <maximumf>, %12, %cst_7 [1] : vector<8x8xf32> to vector<8xf32>
    %14 = vector.shape_cast %13 : vector<8xf32> to vector<8x1xf32>
    %15 = vector.broadcast %14 : vector<8x1xf32> to vector<8x8xf32>
    %16 = arith.subf %12, %15 : vector<8x8xf32>
    %17 = math.exp %16 : vector<8x8xf32>
    %cst_8 = arith.constant dense<0.000000e+00> : vector<8xf32>
    %18 = vector.multi_reduction <add>, %17, %cst_8 [1] : vector<8x8xf32> to vector<8xf32>
    %19 = vector.shape_cast %18 : vector<8xf32> to vector<8x1xf32>
    %20 = tpu.reciprocal %19 {approx = true} : vector<8x1xf32> -> vector<8x1xf32>
    %21 = vector.broadcast %20 : vector<8x1xf32> to vector<8x8xf32>
    %22 = arith.mulf %17, %21 : vector<8x8xf32>
    %cst_9 = arith.constant dense<0.000000e+00> : vector<8x8xf32>
    %23 = tpu.matmul %22, %11, %cst_9 {dimension_numbers = #tpu.dot_dimension_numbers<[1], [0], [0], [1], [0, 0, 1, 1], [], []>} : vector<8x8xf32>, vector<8x8xf32>, vector<8x8xf32> -> vector<8x8xf32>
    %24 = vector.extract_strided_slice %5 {offsets = [0, 0], sizes = [8, 32], strides = [1, 1]} : vector<32x32xf32> to vector<8x32xf32>
    %cst_10 = arith.constant dense<0.000000e+00> : vector<8x32xf32>
    %25 = tpu.matmul %23, %24, %cst_10 {dimension_numbers = #tpu.dot_dimension_numbers<[1], [0], [0], [1], [0, 0, 1, 1], [], []>} : vector<8x8xf32>, vector<8x32xf32>, vector<8x32xf32> -> vector<8x32xf32>
    %26 = vector.broadcast %6 : vector<1x32xf32> to vector<8x32xf32>
    %27 = arith.addf %26, %25 : vector<8x32xf32>
    %28 = vector.extract_strided_slice %2 {offsets = [0, 8], sizes = [8, 8], strides = [1, 1]} : vector<8x32xf32> to vector<8x8xf32>
    %cst_11 = arith.constant 0.353553385 : f32
    %29 = vector.broadcast %cst_11 : f32 to vector<8x8xf32>
    %30 = arith.mulf %28, %29 : vector<8x8xf32>
    %31 = vector.extract_strided_slice %3 {offsets = [0, 8], sizes = [8, 8], strides = [1, 1]} : vector<8x32xf32> to vector<8x8xf32>
    %32 = vector.extract_strided_slice %4 {offsets = [0, 8], sizes = [8, 8], strides = [1, 1]} : vector<8x32xf32> to vector<8x8xf32>
    %cst_12 = arith.constant dense<0.000000e+00> : vector<8x8xf32>
    %33 = tpu.matmul %30, %31, %cst_12 {dimension_numbers = #tpu.dot_dimension_numbers<[1], [1], [0], [0], [0, 0, 1, 0], [], []>} : vector<8x8xf32>, vector<8x8xf32>, vector<8x8xf32> -> vector<8x8xf32>
    %cst_13 = arith.constant dense<0xFF800000> : vector<8xf32>
    %34 = vector.multi_reduction <maximumf>, %33, %cst_13 [1] : vector<8x8xf32> to vector<8xf32>
    %35 = vector.shape_cast %34 : vector<8xf32> to vector<8x1xf32>
    %36 = vector.broadcast %35 : vector<8x1xf32> to vector<8x8xf32>
    %37 = arith.subf %33, %36 : vector<8x8xf32>
    %38 = math.exp %37 : vector<8x8xf32>
    %cst_14 = arith.constant dense<0.000000e+00> : vector<8xf32>
    %39 = vector.multi_reduction <add>, %38, %cst_14 [1] : vector<8x8xf32> to vector<8xf32>
    %40 = vector.shape_cast %39 : vector<8xf32> to vector<8x1xf32>
    %41 = tpu.reciprocal %40 {approx = true} : vector<8x1xf32> -> vector<8x1xf32>
    %42 = vector.broadcast %41 : vector<8x1xf32> to vector<8x8xf32>
    %43 = arith.mulf %38, %42 : vector<8x8xf32>
    %cst_15 = arith.constant dense<0.000000e+00> : vector<8x8xf32>
    %44 = tpu.matmul %43, %32, %cst_15 {dimension_numbers = #tpu.dot_dimension_numbers<[1], [0], [0], [1], [0, 0, 1, 1], [], []>} : vector<8x8xf32>, vector<8x8xf32>, vector<8x8xf32> -> vector<8x8xf32>
    %45 = vector.extract_strided_slice %5 {offsets = [8, 0], sizes = [8, 32], strides = [1, 1]} : vector<32x32xf32> to vector<8x32xf32>
    %cst_16 = arith.constant dense<0.000000e+00> : vector<8x32xf32>
    %46 = tpu.matmul %44, %45, %cst_16 {dimension_numbers = #tpu.dot_dimension_numbers<[1], [0], [0], [1], [0, 0, 1, 1], [], []>} : vector<8x8xf32>, vector<8x32xf32>, vector<8x32xf32> -> vector<8x32xf32>
    %47 = arith.addf %27, %46 : vector<8x32xf32>
    %48 = vector.extract_strided_slice %2 {offsets = [0, 16], sizes = [8, 8], strides = [1, 1]} : vector<8x32xf32> to vector<8x8xf32>
    %cst_17 = arith.constant 0.353553385 : f32
    %49 = vector.broadcast %cst_17 : f32 to vector<8x8xf32>
    %50 = arith.mulf %48, %49 : vector<8x8xf32>
    %51 = vector.extract_strided_slice %3 {offsets = [0, 16], sizes = [8, 8], strides = [1, 1]} : vector<8x32xf32> to vector<8x8xf32>
    %52 = vector.extract_strided_slice %4 {offsets = [0, 16], sizes = [8, 8], strides = [1, 1]} : vector<8x32xf32> to vector<8x8xf32>
    %cst_18 = arith.constant dense<0.000000e+00> : vector<8x8xf32>
    %53 = tpu.matmul %50, %51, %cst_18 {dimension_numbers = #tpu.dot_dimension_numbers<[1], [1], [0], [0], [0, 0, 1, 0], [], []>} : vector<8x8xf32>, vector<8x8xf32>, vector<8x8xf32> -> vector<8x8xf32>
    %cst_19 = arith.constant dense<0xFF800000> : vector<8xf32>
    %54 = vector.multi_reduction <maximumf>, %53, %cst_19 [1] : vector<8x8xf32> to vector<8xf32>
    %55 = vector.shape_cast %54 : vector<8xf32> to vector<8x1xf32>
    %56 = vector.broadcast %55 : vector<8x1xf32> to vector<8x8xf32>
    %57 = arith.subf %53, %56 : vector<8x8xf32>
    %58 = math.exp %57 : vector<8x8xf32>
    %cst_20 = arith.constant dense<0.000000e+00> : vector<8xf32>
    %59 = vector.multi_reduction <add>, %58, %cst_20 [1] : vector<8x8xf32> to vector<8xf32>
    %60 = vector.shape_cast %59 : vector<8xf32> to vector<8x1xf32>
    %61 = tpu.reciprocal %60 {approx = true} : vector<8x1xf32> -> vector<8x1xf32>
    %62 = vector.broadcast %61 : vector<8x1xf32> to vector<8x8xf32>
    %63 = arith.mulf %58, %62 : vector<8x8xf32>
    %cst_21 = arith.constant dense<0.000000e+00> : vector<8x8xf32>
    %64 = tpu.matmul %63, %52, %cst_21 {dimension_numbers = #tpu.dot_dimension_numbers<[1], [0], [0], [1], [0, 0, 1, 1], [], []>} : vector<8x8xf32>, vector<8x8xf32>, vector<8x8xf32> -> vector<8x8xf32>
    %65 = vector.extract_strided_slice %5 {offsets = [16, 0], sizes = [8, 32], strides = [1, 1]} : vector<32x32xf32> to vector<8x32xf32>
    %cst_22 = arith.constant dense<0.000000e+00> : vector<8x32xf32>
    %66 = tpu.matmul %64, %65, %cst_22 {dimension_numbers = #tpu.dot_dimension_numbers<[1], [0], [0], [1], [0, 0, 1, 1], [], []>} : vector<8x8xf32>, vector<8x32xf32>, vector<8x32xf32> -> vector<8x32xf32>
    %67 = arith.addf %47, %66 : vector<8x32xf32>
    %68 = vector.extract_strided_slice %2 {offsets = [0, 24], sizes = [8, 8], strides = [1, 1]} : vector<8x32xf32> to vector<8x8xf32>
    %cst_23 = arith.constant 0.353553385 : f32
    %69 = vector.broadcast %cst_23 : f32 to vector<8x8xf32>
    %70 = arith.mulf %68, %69 : vector<8x8xf32>
    %71 = vector.extract_strided_slice %3 {offsets = [0, 24], sizes = [8, 8], strides = [1, 1]} : vector<8x32xf32> to vector<8x8xf32>
    %72 = vector.extract_strided_slice %4 {offsets = [0, 24], sizes = [8, 8], strides = [1, 1]} : vector<8x32xf32> to vector<8x8xf32>
    %cst_24 = arith.constant dense<0.000000e+00> : vector<8x8xf32>
    %73 = tpu.matmul %70, %71, %cst_24 {dimension_numbers = #tpu.dot_dimension_numbers<[1], [1], [0], [0], [0, 0, 1, 0], [], []>} : vector<8x8xf32>, vector<8x8xf32>, vector<8x8xf32> -> vector<8x8xf32>
    %cst_25 = arith.constant dense<0xFF800000> : vector<8xf32>
    %74 = vector.multi_reduction <maximumf>, %73, %cst_25 [1] : vector<8x8xf32> to vector<8xf32>
    %75 = vector.shape_cast %74 : vector<8xf32> to vector<8x1xf32>
    %76 = vector.broadcast %75 : vector<8x1xf32> to vector<8x8xf32>
    %77 = arith.subf %73, %76 : vector<8x8xf32>
    %78 = math.exp %77 : vector<8x8xf32>
    %cst_26 = arith.constant dense<0.000000e+00> : vector<8xf32>
    %79 = vector.multi_reduction <add>, %78, %cst_26 [1] : vector<8x8xf32> to vector<8xf32>
    %80 = vector.shape_cast %79 : vector<8xf32> to vector<8x1xf32>
    %81 = tpu.reciprocal %80 {approx = true} : vector<8x1xf32> -> vector<8x1xf32>
    %82 = vector.broadcast %81 : vector<8x1xf32> to vector<8x8xf32>
    %83 = arith.mulf %78, %82 : vector<8x8xf32>
    %cst_27 = arith.constant dense<0.000000e+00> : vector<8x8xf32>
    %84 = tpu.matmul %83, %72, %cst_27 {dimension_numbers = #tpu.dot_dimension_numbers<[1], [0], [0], [1], [0, 0, 1, 1], [], []>} : vector<8x8xf32>, vector<8x8xf32>, vector<8x8xf32> -> vector<8x8xf32>
    %85 = vector.extract_strided_slice %5 {offsets = [24, 0], sizes = [8, 32], strides = [1, 1]} : vector<32x32xf32> to vector<8x32xf32>
    %cst_28 = arith.constant dense<0.000000e+00> : vector<8x32xf32>
    %86 = tpu.matmul %84, %85, %cst_28 {dimension_numbers = #tpu.dot_dimension_numbers<[1], [0], [0], [1], [0, 0, 1, 1], [], []>} : vector<8x8xf32>, vector<8x32xf32>, vector<8x32xf32> -> vector<8x32xf32>
    %87 = arith.addf %67, %86 : vector<8x32xf32>
    %c0_29 = arith.constant 0 : index
    %c0_30 = arith.constant 0 : index
    %c0_31 = arith.constant 0 : index
    %88 = vector.load %arg2[%c0_29, %c0_30, %c0_31] : memref<1x8x32xf32, #tpu.memory_space<vmem>>, vector<1x8x32xf32>
    %89 = vector.shape_cast %88 : vector<1x8x32xf32> to vector<8x32xf32>
    %90 = arith.addf %87, %89 : vector<8x32xf32>
    %cst_32 = arith.constant dense<0.000000e+00> : vector<8xf32>
    %91 = vector.multi_reduction <add>, %90, %cst_32 [1] : vector<8x32xf32> to vector<8xf32>
    %92 = vector.shape_cast %91 : vector<8xf32> to vector<8x1xf32>
    %cst_33 = arith.constant 3.200000e+01 : f32
    %93 = vector.broadcast %cst_33 : f32 to vector<8x1xf32>
    %94 = arith.divf %92, %93 : vector<8x1xf32>
    %95 = vector.broadcast %94 : vector<8x1xf32> to vector<8x32xf32>
    %96 = arith.subf %90, %95 : vector<8x32xf32>
    %97 = arith.mulf %96, %96 : vector<8x32xf32>
    %cst_34 = arith.constant dense<0.000000e+00> : vector<8xf32>
    %98 = vector.multi_reduction <add>, %97, %cst_34 [1] : vector<8x32xf32> to vector<8xf32>
    %99 = vector.shape_cast %98 : vector<8xf32> to vector<8x1xf32>
    %cst_35 = arith.constant 3.200000e+01 : f32
    %100 = vector.broadcast %cst_35 : f32 to vector<8x1xf32>
    %101 = arith.divf %99, %100 : vector<8x1xf32>
    %102 = vector.broadcast %94 : vector<8x1xf32> to vector<8x32xf32>
    %103 = arith.subf %90, %102 : vector<8x32xf32>
    %cst_36 = arith.constant 9.99999974E-6 : f32
    %104 = vector.broadcast %cst_36 : f32 to vector<8x1xf32>
    %105 = arith.addf %101, %104 : vector<8x1xf32>
    %106 = math.rsqrt %105 : vector<8x1xf32>
    %107 = vector.broadcast %106 : vector<8x1xf32> to vector<8x32xf32>
    %108 = arith.mulf %103, %107 : vector<8x32xf32>
    %c0_37 = arith.constant 0 : index
    %c0_38 = arith.constant 0 : index
    %109 = vector.load %arg5[%c0_37, %c0_38] : memref<1x32xf32, #tpu.memory_space<vmem>>, vector<1x32xf32>
    %110 = vector.broadcast %109 : vector<1x32xf32> to vector<8x32xf32>
    %111 = arith.mulf %108, %110 : vector<8x32xf32>
    %c0_39 = arith.constant 0 : index
    %c0_40 = arith.constant 0 : index
    %112 = vector.load %arg6[%c0_39, %c0_40] : memref<1x32xf32, #tpu.memory_space<vmem>>, vector<1x32xf32>
    %113 = vector.broadcast %112 : vector<1x32xf32> to vector<8x32xf32>
    %114 = arith.addf %111, %113 : vector<8x32xf32>
    %c0_41 = arith.constant 0 : index
    %c0_42 = arith.constant 0 : index
    %c0_43 = arith.constant 0 : index
    %115 = vector.load %arg7[%c0_41, %c0_42, %c0_43] : memref<1x8x32xf32, #tpu.memory_space<vmem>>, vector<1x8x32xf32>
    %116 = vector.shape_cast %115 : vector<1x8x32xf32> to vector<8x32xf32>
    %117 = vector.shape_cast %114 : vector<8x32xf32> to vector<1x8x32xf32>
    tpu.vector_store %arg7[%c0_41, %c0_42, %c0_43], %117 {strides = array<i32>} : memref<1x8x32xf32, #tpu.memory_space<vmem>>, vector<1x8x32xf32>,
    return
  }
  func.func @transform_0(%arg0: i32) -> (i32, i32, i32) {
    %c0_i32 = arith.constant 0 : i32
    %c0_i32_0 = arith.constant 0 : i32
    %c0_i32_1 = arith.constant 0 : i32
    return %arg0, %c0_i32, %c0_i32_0 : i32, i32, i32
  }
  func.func @transform_1(%arg0: i32) -> (i32, i32, i32) {
    %c0_i32 = arith.constant 0 : i32
    %c0_i32_0 = arith.constant 0 : i32
    %c0_i32_1 = arith.constant 0 : i32
    return %arg0, %c0_i32, %c0_i32_0 : i32, i32, i32
  }
  func.func @transform_2(%arg0: i32) -> (i32, i32) {
    %c0_i32 = arith.constant 0 : i32
    %c0_i32_0 = arith.constant 0 : i32
    %c0_i32_1 = arith.constant 0 : i32
    return %c0_i32, %c0_i32_0 : i32, i32
  }
  func.func @transform_3(%arg0: i32) -> (i32, i32) {
    %c0_i32 = arith.constant 0 : i32
    %c0_i32_0 = arith.constant 0 : i32
    %c0_i32_1 = arith.constant 0 : i32
    return %c0_i32, %c0_i32_0 : i32, i32
  }
  func.func @transform_4(%arg0: i32) -> (i32, i32) {
    %c0_i32 = arith.constant 0 : i32
    %c0_i32_0 = arith.constant 0 : i32
    %c0_i32_1 = arith.constant 0 : i32
    return %c0_i32, %c0_i32_0 : i32, i32
  }
  func.func @transform_5(%arg0: i32) -> (i32, i32) {
    %c0_i32 = arith.constant 0 : i32
    %c0_i32_0 = arith.constant 0 : i32
    %c0_i32_1 = arith.constant 0 : i32
    return %c0_i32, %c0_i32_0 : i32, i32
  }
  func.func @transform_6(%arg0: i32) -> (i32, i32, i32) {
    %c0_i32 = arith.constant 0 : i32
    %c0_i32_0 = arith.constant 0 : i32
    %c0_i32_1 = arith.constant 0 : i32
    return %arg0, %c0_i32, %c0_i32_0 : i32, i32, i32
  }
}

module attributes {stable_mosaic.version = 11 : i64} {
  func.func @_ffn_ln_kernel(%arg0: i32, %arg1: i32, %arg2: memref<24x32xf32, #tpu.memory_space<vmem>>, %arg3: memref<32x64xf32, #tpu.memory_space<vmem>>, %arg4: memref<1x64xf32, #tpu.memory_space<vmem>>, %arg5: memref<64x32xf32, #tpu.memory_space<vmem>>, %arg6: memref<1x32xf32, #tpu.memory_space<vmem>>, %arg7: memref<1x32xf32, #tpu.memory_space<vmem>>, %arg8: memref<1x32xf32, #tpu.memory_space<vmem>>, %arg9: memref<24x32xf32, #tpu.memory_space<vmem>>, %arg10: memref<24x32xf32, #tpu.memory_space<vmem>>) attributes {dimension_semantics = [#tpu.dimension_semantics<parallel>, #tpu.dimension_semantics<arbitrary>], iteration_bounds = array<i64: 1, 1>, scalar_prefetch = 0 : i64, scratch_operands = 1 : i64, tpu.core_type = #tpu.core_type<tc>, window_params = [{transform_indices = @transform_0, window_bounds = array<i64: 24, 32>}, {transform_indices = @transform_1, window_bounds = array<i64: 32, 64>}, {transform_indices = @transform_2, window_bounds = array<i64: 1, 64>}, {transform_indices = @transform_3, window_bounds = array<i64: 64, 32>}, {pipeline_mode = #tpu.pipeline_mode<synchronous>, transform_indices = @transform_4, window_bounds = array<i64: 1, 32>}, {pipeline_mode = #tpu.pipeline_mode<synchronous>, transform_indices = @transform_5, window_bounds = array<i64: 1, 32>}, {pipeline_mode = #tpu.pipeline_mode<synchronous>, transform_indices = @transform_6, window_bounds = array<i64: 1, 32>}, {transform_indices = @transform_7, window_bounds = array<i64: 24, 32>}]} {
    %c0_i32 = arith.constant 0 : i32
    %0 = arith.cmpi eq, %arg1, %c0_i32 : i32
    %1 = arith.extui %0 : i1 to i32
    %c0_i32_0 = arith.constant 0 : i32
    %2 = arith.cmpi ne, %1, %c0_i32_0 : i32
    scf.if %2 {
      %cst_16 = arith.constant 0.000000e+00 : f32
      %19 = vector.broadcast %cst_16 : f32 to vector<24x32xf32>
      %c0_17 = arith.constant 0 : index
      %c0_18 = arith.constant 0 : index
      %20 = vector.load %arg10[%c0_17, %c0_18] : memref<24x32xf32, #tpu.memory_space<vmem>>, vector<24x32xf32>
      tpu.vector_store %arg10[%c0_17, %c0_18], %19 {strides = array<i32>} : memref<24x32xf32, #tpu.memory_space<vmem>>, vector<24x32xf32>,
    } else {
    }
    %c0 = arith.constant 0 : index
    %c0_1 = arith.constant 0 : index
    %3 = vector.load %arg2[%c0, %c0_1] : memref<24x32xf32, #tpu.memory_space<vmem>>, vector<24x32xf32>
    %c0_2 = arith.constant 0 : index
    %c0_3 = arith.constant 0 : index
    %4 = vector.load %arg3[%c0_2, %c0_3] : memref<32x64xf32, #tpu.memory_space<vmem>>, vector<32x64xf32>
    %cst = arith.constant dense<0.000000e+00> : vector<24x64xf32>
    %5 = tpu.matmul %3, %4, %cst {dimension_numbers = #tpu.dot_dimension_numbers<[1], [0], [0], [1], [0, 0, 1, 1], [], []>} : vector<24x32xf32>, vector<32x64xf32>, vector<24x64xf32> -> vector<24x64xf32>
    %c0_4 = arith.constant 0 : index
    %c0_5 = arith.constant 0 : index
    %6 = vector.load %arg4[%c0_4, %c0_5] : memref<1x64xf32, #tpu.memory_space<vmem>>, vector<1x64xf32>
    %7 = vector.broadcast %6 : vector<1x64xf32> to vector<24x64xf32>
    %8 = arith.addf %5, %7 : vector<24x64xf32>
    %cst_6 = arith.constant 0.000000e+00 : f32
    %9 = vector.broadcast %cst_6 : f32 to vector<24x64xf32>
    %10 = arith.maximumf %8, %9 : vector<24x64xf32>
    %c0_7 = arith.constant 0 : index
    %c0_8 = arith.constant 0 : index
    %11 = vector.load %arg10[%c0_7, %c0_8] : memref<24x32xf32, #tpu.memory_space<vmem>>, vector<24x32xf32>
    %c0_9 = arith.constant 0 : index
    %c0_10 = arith.constant 0 : index
    %12 = vector.load %arg5[%c0_9, %c0_10] : memref<64x32xf32, #tpu.memory_space<vmem>>, vector<64x32xf32>
    %cst_11 = arith.constant dense<0.000000e+00> : vector<24x32xf32>
    %13 = tpu.matmul %10, %12, %cst_11 {dimension_numbers = #tpu.dot_dimension_numbers<[1], [0], [0], [1], [0, 0, 1, 1], [], []>} : vector<24x64xf32>, vector<64x32xf32>, vector<24x32xf32> -> vector<24x32xf32>
    %14 = arith.addf %11, %13 : vector<24x32xf32>
    %c0_12 = arith.constant 0 : index
    %c0_13 = arith.constant 0 : index
    %15 = vector.load %arg10[%c0_12, %c0_13] : memref<24x32xf32, #tpu.memory_space<vmem>>, vector<24x32xf32>
    tpu.vector_store %arg10[%c0_12, %c0_13], %14 {strides = array<i32>} : memref<24x32xf32, #tpu.memory_space<vmem>>, vector<24x32xf32>,
    %c0_i32_14 = arith.constant 0 : i32
    %16 = arith.cmpi eq, %arg1, %c0_i32_14 : i32
    %17 = arith.extui %16 : i1 to i32
    %c0_i32_15 = arith.constant 0 : i32
    %18 = arith.cmpi ne, %17, %c0_i32_15 : i32
    scf.if %18 {
      %c0_16 = arith.constant 0 : index
      %c0_17 = arith.constant 0 : index
      %19 = vector.load %arg10[%c0_16, %c0_17] : memref<24x32xf32, #tpu.memory_space<vmem>>, vector<24x32xf32>
      %c0_18 = arith.constant 0 : index
      %c0_19 = arith.constant 0 : index
      %20 = vector.load %arg6[%c0_18, %c0_19] : memref<1x32xf32, #tpu.memory_space<vmem>>, vector<1x32xf32>
      %21 = vector.broadcast %20 : vector<1x32xf32> to vector<24x32xf32>
      %22 = arith.addf %19, %21 : vector<24x32xf32>
      %c0_20 = arith.constant 0 : index
      %c0_21 = arith.constant 0 : index
      %23 = vector.load %arg2[%c0_20, %c0_21] : memref<24x32xf32, #tpu.memory_space<vmem>>, vector<24x32xf32>
      %24 = arith.addf %22, %23 : vector<24x32xf32>
      %cst_22 = arith.constant dense<0.000000e+00> : vector<24xf32>
      %25 = vector.multi_reduction <add>, %24, %cst_22 [1] : vector<24x32xf32> to vector<24xf32>
      %26 = vector.shape_cast %25 : vector<24xf32> to vector<24x1xf32>
      %cst_23 = arith.constant 3.200000e+01 : f32
      %27 = vector.broadcast %cst_23 : f32 to vector<24x1xf32>
      %28 = arith.divf %26, %27 : vector<24x1xf32>
      %29 = vector.broadcast %28 : vector<24x1xf32> to vector<24x32xf32>
      %30 = arith.subf %24, %29 : vector<24x32xf32>
      %31 = arith.mulf %30, %30 : vector<24x32xf32>
      %cst_24 = arith.constant dense<0.000000e+00> : vector<24xf32>
      %32 = vector.multi_reduction <add>, %31, %cst_24 [1] : vector<24x32xf32> to vector<24xf32>
      %33 = vector.shape_cast %32 : vector<24xf32> to vector<24x1xf32>
      %cst_25 = arith.constant 3.200000e+01 : f32
      %34 = vector.broadcast %cst_25 : f32 to vector<24x1xf32>
      %35 = arith.divf %33, %34 : vector<24x1xf32>
      %36 = vector.broadcast %28 : vector<24x1xf32> to vector<24x32xf32>
      %37 = arith.subf %24, %36 : vector<24x32xf32>
      %cst_26 = arith.constant 9.99999974E-6 : f32
      %38 = vector.broadcast %cst_26 : f32 to vector<24x1xf32>
      %39 = arith.addf %35, %38 : vector<24x1xf32>
      %40 = math.rsqrt %39 : vector<24x1xf32>
      %41 = vector.broadcast %40 : vector<24x1xf32> to vector<24x32xf32>
      %42 = arith.mulf %37, %41 : vector<24x32xf32>
      %c0_27 = arith.constant 0 : index
      %c0_28 = arith.constant 0 : index
      %43 = vector.load %arg7[%c0_27, %c0_28] : memref<1x32xf32, #tpu.memory_space<vmem>>, vector<1x32xf32>
      %44 = vector.broadcast %43 : vector<1x32xf32> to vector<24x32xf32>
      %45 = arith.mulf %42, %44 : vector<24x32xf32>
      %c0_29 = arith.constant 0 : index
      %c0_30 = arith.constant 0 : index
      %46 = vector.load %arg8[%c0_29, %c0_30] : memref<1x32xf32, #tpu.memory_space<vmem>>, vector<1x32xf32>
      %47 = vector.broadcast %46 : vector<1x32xf32> to vector<24x32xf32>
      %48 = arith.addf %45, %47 : vector<24x32xf32>
      %c0_31 = arith.constant 0 : index
      %c0_32 = arith.constant 0 : index
      %49 = vector.load %arg9[%c0_31, %c0_32] : memref<24x32xf32, #tpu.memory_space<vmem>>, vector<24x32xf32>
      tpu.vector_store %arg9[%c0_31, %c0_32], %48 {strides = array<i32>} : memref<24x32xf32, #tpu.memory_space<vmem>>, vector<24x32xf32>,
    } else {
    }
    return
  }
  func.func @transform_0(%arg0: i32, %arg1: i32) -> (i32, i32) {
    %c0_i32 = arith.constant 0 : i32
    %c0_i32_0 = arith.constant 0 : i32
    return %arg0, %c0_i32 : i32, i32
  }
  func.func @transform_1(%arg0: i32, %arg1: i32) -> (i32, i32) {
    %c0_i32 = arith.constant 0 : i32
    %c0_i32_0 = arith.constant 0 : i32
    return %c0_i32, %arg1 : i32, i32
  }
  func.func @transform_2(%arg0: i32, %arg1: i32) -> (i32, i32) {
    %c0_i32 = arith.constant 0 : i32
    %c0_i32_0 = arith.constant 0 : i32
    return %c0_i32, %arg1 : i32, i32
  }
  func.func @transform_3(%arg0: i32, %arg1: i32) -> (i32, i32) {
    %c0_i32 = arith.constant 0 : i32
    %c0_i32_0 = arith.constant 0 : i32
    return %arg1, %c0_i32 : i32, i32
  }
  func.func @transform_4(%arg0: i32, %arg1: i32) -> (i32, i32) {
    %c0_i32 = arith.constant 0 : i32
    %c0_i32_0 = arith.constant 0 : i32
    %c0_i32_1 = arith.constant 0 : i32
    return %c0_i32, %c0_i32_0 : i32, i32
  }
  func.func @transform_5(%arg0: i32, %arg1: i32) -> (i32, i32) {
    %c0_i32 = arith.constant 0 : i32
    %c0_i32_0 = arith.constant 0 : i32
    %c0_i32_1 = arith.constant 0 : i32
    return %c0_i32, %c0_i32_0 : i32, i32
  }
  func.func @transform_6(%arg0: i32, %arg1: i32) -> (i32, i32) {
    %c0_i32 = arith.constant 0 : i32
    %c0_i32_0 = arith.constant 0 : i32
    %c0_i32_1 = arith.constant 0 : i32
    return %c0_i32, %c0_i32_0 : i32, i32
  }
  func.func @transform_7(%arg0: i32, %arg1: i32) -> (i32, i32) {
    %c0_i32 = arith.constant 0 : i32
    %c0_i32_0 = arith.constant 0 : i32
    return %arg0, %c0_i32 : i32, i32
  }
}

</mosaic_0001>

<bundles_post_ra>
// kernel: flash_scgpt_layer.4
= control target key start
LH: loop header
LB: loop body
LE: loop exit
PB: predicated region body
PF: predicated region fallthrough
CT: control target
= control target key end

     0   :  { %v167_v0 = vmov 0.0|0.0   ;;  %vm168_vm0 = vmmov 0   ;;  %v169_v6 = vmov 0.0   ;;  %vm28_vm1 = vcmask 261120   ;;  %s226_s1 = inlined_call_operand.vmem [shape: f32[32,96], index: 1, kind: input, shape index: {}]   ;;  %s227_s0 = inlined_call_operand.vmem [shape: f32[24,32], index: 0, kind: input, shape index: {}]   ;;  %s228_s2 = inlined_call_operand.vmem [shape: f32[1,96], index: 2, kind: input, shape index: {}]   ;;  %s229_s3 = inlined_call_operand.vmem [shape: f32[24,96], index: 3, kind: output, shape index: {}]  }
   0x1   :  { %160 = vmatprep.subr.bf16.mxu1 %v167_v0  ;;  %v17_v1 = vld [vmem:[%s226_s1] sm:$0xff]  ;;  %v18_v2 = vld [vmem:[%s226_s1 + $0x8] sm:$0xff]  ;;  %154 = vmatprep.subr.bf16.mxu0 %v167_v0  ;;  %v19_v3 = vld [vmem:[%s226_s1 + $0x10] sm:$0xff]  ;;  %vm118_vm2 = vcmask 785408  }
   0x2   :  { %v155_v4 = vpack.c.bf16 %v18_v2, %v17_v1  ;;  %v20_v5 = vld [vmem:[%s226_s1 + $0x18] sm:$0xff]  ;;  %148 = vmatprep.mubr.msk.f32.mxu1 %vm168_vm0, %v169_v6  ;;  %145 = vmatprep.mubr.msk.f32.mxu0 %vm168_vm0, %v169_v6  ;;  %v15_v8 = vld [vmem:[%s227_s0 + $0x8] sm:$0xff]  ;;  %v14_v9 = vld [vmem:[%s227_s0] sm:$0xff] }
   0x3   :  { %v158_v7 = vpack.c.bf16 %v20_v5, %v19_v3  ;;  %v16_v10 = vld [vmem:[%s227_s0 + $0x10] sm:$0xff]  ;;  %v126_v11 = vld [vmem:[%s228_s2] ss:$0 sm:$0xff] }
   0x4   :  { %162 = vmatpush3.bf16.msra.mxu1 %v155_v4  ;;  %156 = vmatpush3.bf16.msra.mxu0 %v155_v4 }
   0x5   :  { %161 = vmatprep.subr.bf16.mxu1 %v167_v0  ;;  %157 = vmatprep.subr.bf16.mxu0 %v167_v0 }
   0x8   :  { %163 = vmatpush3.bf16.msra.mxu1 %v158_v7  ;;  %159 = vmatpush3.bf16.msra.mxu0 %v158_v7 }
   0xb   :  { %149 = vmatmul.mubr.msk.f32.vlgmr.msra.gmra.mrb[0].mxu1 %vm28_vm1, %v15_v8  ;;  %146 = vmatmul.mubr.msk.f32.vlgmr.msra.gmra.mrb[0].mxu0 %vm28_vm1, %v14_v9 }
   0xc   :  { %151 = vmatprep.mubr.msk.f32.mxu1 %vm168_vm0, %v169_v6 }
   0xf   :  { %152 = vmatmul.mubr.msk.f32.gmra.mrb[2].mxu1 %vm28_vm1, %v16_v10 }
  0xde   :  { %v109_v12 = vpop.f32.mrb[0].mxu1  ;;  %v104_v13 = vpop.f32.mrb[0].mxu0 }
  0xdf   :  { %v110_v14 = vadd.f32 %v126_v11, %v109_v12  ;;  %v150_v15 = vpop.f32.mrb[1].mxu1  ;;  %v105_v16 = vadd.f32 %v126_v11, %v104_v13  ;;  %v147_v17 = vpop.f32.mrb[1].mxu0 }
  0xe1   :  { %120 = vst.msk [vmem:[%s229_s3 + $0x8] sm:$0xff] %vm118_vm2, %v110_v14  ;;  %119 = vst.msk [vmem:[%s229_s3] sm:$0xff] %vm118_vm2, %v105_v16 }
  0xe2   :  { %v114_v18 = vpop.f32.mrb[2].mxu1 }
  0xe3   :  { %v115_v19 = vadd.f32 %v126_v11, %v114_v18  ;;  %v153_v20 = vpop.f32.mrb[3].mxu1 }
  0xe5   :  { %121 = vst.msk [vmem:[%s229_s3 + $0x10] sm:$0xff] %vm118_vm2, %v115_v19 }

// kernel: flash_scgpt_layer.7
= control target key start
LH: loop header
LB: loop body
LE: loop exit
PB: predicated region body
PF: predicated region fallthrough
CT: control target
= control target key end

     0   :  { %vm30_vm0 = vcmask 261120   ;;  %v434_v0 = vmov 0.0|0.0   ;;  %vm435_vm1 = vmmov 0   ;;  %v436_v4 = vmov 0.0   ;;  %s567_s1 = inlined_call_operand.vmem [shape: f32[32,64], index: 1, kind: input, shape index: {}]   ;;  %s568_s3 = inlined_call_operand.vmem [shape: f32[64,32], index: 3, kind: input, shape index: {}]   ;;  %s569_s0 = inlined_call_operand.vmem [shape: f32[24,32], index: 0, kind: input, shape index: {}]   ;;  %s570_s2 = inlined_call_operand.vmem [shape: f32[1,64], index: 2, kind: input, shape index: {}]   ;;  %s571_s4 = inlined_call_operand.vmem [shape: f32[1,32], index: 4, kind: input, shape index: {}]   ;;  %s572_s5 = inlined_call_operand.vmem [shape: f32[1,32], index: 5, kind: input, shape index: {}]   ;;  %s573_s6 = inlined_call_operand.vmem [shape: f32[1,32], index: 6, kind: input, shape index: {}]   ;;  %s574_s7 = inlined_call_operand.vmem [shape: f32[24,32], index: 7, kind: output, shape index: {}]  }
   0x1   :  { %407 = vmatprep.subr.bf16.mxu0 %v434_v0  ;;  %v37_v1 = vld [vmem:[%s567_s1] sm:$0xff]  ;;  %v38_v2 = vld [vmem:[%s567_s1 + $0x8] sm:$0xff]  ;;  %v39_v3 = vld [vmem:[%s567_s1 + $0x10] sm:$0xff]  ;;  %373 = vmatprep.mubr.msk.f32.mxu0 %vm435_vm1, %v436_v4  ;;  %31 = vst.msk [vmem:[#allocation2] sm:$0xff] %vm30_vm0, %v436_v4  ;;  %vm152_vm2 = vcmask 523264  }
   0x2   :  { %32 = vst.msk [vmem:[#allocation2 + $0x8] sm:$0xff] %vm30_vm0, %v436_v4  ;;  %33 = vst.msk [vmem:[#allocation2 + $0x10] sm:$0xff] %vm30_vm0, %v436_v4  ;;  %v408_v5 = vpack.c.bf16 %v38_v2, %v37_v1  ;;  %v40_v6 = vld [vmem:[%s567_s1 + $0x18] sm:$0xff]  ;;  %413 = vmatprep.subr.bf16.mxu1 %v434_v0  ;;  %398 = vmatprep.mubr.msk.f32.mxu1 %vm435_vm1, %v436_v4  ;;  %v144_v7 = vld [vmem:[%s568_s3] sm:$0xff] }
   0x3   :  { %v145_v8 = vld [vmem:[%s568_s3 + $0x8] sm:$0xff]  ;;  %v411_v9 = vpack.c.bf16 %v40_v6, %v39_v3  ;;  %v146_v11 = vld [vmem:[%s568_s3 + $0x10] sm:$0xff]  ;;  %v147_v12 = vld [vmem:[%s568_s3 + $0x18] sm:$0xff] }
   0x4   :  { %409 = vmatpush3.bf16.msra.mxu0 %v408_v5  ;;  %v414_v10 = vpack.c.bf16 %v145_v8, %v144_v7  ;;  %v417_v13 = vpack.c.bf16 %v147_v12, %v146_v11  ;;  %v148_v14 = vld [vmem:[%s568_s3 + $0x20] sm:$0xff]  ;;  %v149_v15 = vld [vmem:[%s568_s3 + $0x28] sm:$0xff]  ;;  %v36_v19 = vld [vmem:[%s569_s0 + $0x10] sm:$0xff] }
   0x5   :  { %410 = vmatprep.subr.bf16.mxu0 %v434_v0  ;;  %v34_v16 = vld [vmem:[%s569_s0] sm:$0xff]  ;;  %v420_v17 = vpack.c.bf16 %v149_v15, %v148_v14  ;;  %v35_v18 = vld [vmem:[%s569_s0 + $0x8] sm:$0xff]  ;;  %v150_v20 = vld [vmem:[%s568_s3 + $0x30] sm:$0xff] }
   0x6   :  { %415 = vmatpush3.bf16.msra.mxu1 %v414_v10  ;;  %v151_v21 = vld [vmem:[%s568_s3 + $0x38] sm:$0xff]  ;;  %v337_v23 = vld [vmem:[%s570_s2] ss:$0 sm:$0xff] }
   0x7   :  { %416 = vmatprep.subr.bf16.mxu1 %v434_v0  ;;  %v423_v22 = vpack.c.bf16 %v151_v21, %v150_v20  ;;  %v344_v46 = vld [vmem:[%s571_s4] ss:$0 sm:$0xff] }
   0x8   :  { %412 = vmatpush3.bf16.msra.mxu0 %v411_v9  ;;  %v141_v36 = vld [vmem:[#allocation2] sm:$0xff] }
   0x9   :  { %v142_v40 = vld [vmem:[#allocation2 + $0x8] sm:$0xff]  ;;  %v143_v44 = vld [vmem:[#allocation2 + $0x10] sm:$0xff] }
   0xa   :  { %418 = vmatpush3.bf16.msra.mxu1 %v417_v13 }
   0xb   :  { %374 = vmatmul.mubr.msk.f32.vlgmr.msra.gmra.mrb[0].mxu0 %vm30_vm0, %v34_v16  ;;  %419 = vmatprep.subr.bf16.mxu1 %v434_v0 }
   0xc   :  { %376 = vmatprep.mubr.msk.f32.mxu0 %vm435_vm1, %v436_v4 }
   0xe   :  { %421 = vmatpush3.bf16.msra.mxu1 %v420_v17 }
   0xf   :  { %377 = vmatmul.mubr.msk.f32.gmra.mrb[2].mxu0 %vm30_vm0, %v35_v18  ;;  %422 = vmatprep.subr.bf16.mxu1 %v434_v0 }
  0x10   :  { %379 = vmatprep.mubr.msk.f32.mxu0 %vm435_vm1, %v436_v4 }
  0x12   :  { %424 = vmatpush3.bf16.msra.mxu1 %v423_v22  ;;  %v345_v22 = vld [vmem:[%s572_s5] ss:$0 sm:$0xff] }
  0x13   :  { %380 = vmatmul.mubr.msk.f32.gmra.mrb[4].mxu0 %vm30_vm0, %v36_v19 }
  0xde   :  { %v124_v24 = vpop.f32.mrb[0].mxu0 }
  0xdf   :  { %v125_v25 = vadd.f32 %v337_v23, %v124_v24  ;;  %v375_v26 = vpop.f32.mrb[1].mxu0  ;;  %v346_v24 = vld [vmem:[%s573_s6] ss:$0 sm:$0xff] }
  0xe1   :  { %v138_v27 = vmax.f32 %v125_v25, 0.0 }
  0xe2   :  { %v129_v28 = vpop.f32.mrb[2].mxu0 }
  0xe3   :  { %v130_v29 = vadd.f32 %v337_v23, %v129_v28  ;;  %v378_v30 = vpop.f32.mrb[3].mxu0  ;;  %399 = vmatmul.mubr.msk.f32.vlgmr.msra.gmra.mrb[0].mxu1 %vm152_vm2, %v138_v27 }
  0xe4   :  { %401 = vmatprep.mubr.msk.f32.mxu1 %vm435_vm1, %v436_v4 }
  0xe5   :  { %v139_v31 = vmax.f32 %v130_v29, 0.0 }
  0xe6   :  { %v134_v32 = vpop.f32.mrb[4].mxu0 }
  0xe7   :  { %v135_v33 = vadd.f32 %v337_v23, %v134_v32  ;;  %v381_v34 = vpop.f32.mrb[5].mxu0  ;;  %402 = vmatmul.mubr.msk.f32.gmra.mrb[2].mxu1 %vm152_vm2, %v139_v31 }
  0xe8   :  { %404 = vmatprep.mubr.msk.f32.mxu1 %vm435_vm1, %v436_v4 }
  0xe9   :  { %v140_v35 = vmax.f32 %v135_v33, 0.0 }
  0xeb   :  { %405 = vmatmul.mubr.msk.f32.gmra.mrb[4].mxu1 %vm152_vm2, %v140_v35 }
 0x1b6   :  { %v228_v37 = vpop.f32.mrb[0].mxu1 }
 0x1b7   :  { %v242_v38 = vadd.f32 %v228_v37, %v141_v36  ;;  %v400_v39 = vpop.f32.mrb[1].mxu1 }
 0x1b9   :  { %245 = vst.msk [vmem:[#allocation2] sm:$0xff] %vm30_vm0, %v242_v38 }
 0x1ba   :  { %v233_v41 = vpop.f32.mrb[2].mxu1 }
 0x1bb   :  { %v243_v42 = vadd.f32 %v233_v41, %v142_v40  ;;  %v403_v43 = vpop.f32.mrb[3].mxu1 }
 0x1bd   :  { %246 = vst.msk [vmem:[#allocation2 + $0x8] sm:$0xff] %vm30_vm0, %v243_v42 }
 0x1be   :  { %v238_v45 = vpop.f32.mrb[4].mxu1 }
 0x1bf   :  { %v244_v47 = vadd.f32 %v238_v45, %v143_v44  ;;  %v406_v48 = vpop.f32.mrb[5].mxu1 }
 0x1c0   :  { %v251_v49 = vld [vmem:[#allocation2] sm:$0xff] }
 0x1c1   :  { %247 = vst.msk [vmem:[#allocation2 + $0x10] sm:$0xff] %vm30_vm0, %v244_v47  ;;  %v261_v50 = vadd.f32 %v344_v46, %v251_v49 }
 0x1c3   :  { %v267_v51 = vadd.f32 %v261_v50, %v34_v16 }
 0x1c4   :  { %v252_v52 = vld [vmem:[#allocation2 + $0x8] sm:$0xff] }
 0x1c5   :  { %v270_v53 = vsel %vm30_vm0, %v267_v51, 0.0  ;;  %v262_v54 = vadd.f32 %v344_v46, %v252_v52 }
 0x1c6   :  { %271 = vadd.xlane.f32.xlu0 %v270_v53 }
 0x1c7   :  { %v268_v55 = vadd.f32 %v262_v54, %v35_v18 }
 0x1c8   :  { %v253_v56 = vld [vmem:[#allocation2 + $0x10] sm:$0xff] }
 0x1c9   :  { %v273_v57 = vsel %vm30_vm0, %v268_v55, 0.0  ;;  %v263_v58 = vadd.f32 %v344_v46, %v253_v56 }
 0x1ca   :  { %274 = vadd.xlane.f32.xlu0 %v273_v57 }
 0x1cb   :  { %v269_v59 = vadd.f32 %v263_v58, %v36_v19 }
 0x1cd   :  { %v276_v60 = vsel %vm30_vm0, %v269_v59, 0.0 }
 0x1ce   :  { %277 = vadd.xlane.f32.xlu1 %v276_v60 }
 0x253   :  { %v272_v61 = vpop.xlane.xlu0 %271 }
 0x254   :  { %v280_v62 = vmul.f32 0.03125, %v272_v61 }
 0x256   :  { %v283_v63 = vsub.f32 %v267_v51, %v280_v62 }
 0x257   :  { %v275_v0 = vpop.xlane.xlu0 %274 }
 0x258   :  { %v281_v1 = vmul.f32 0.03125, %v275_v0  ;;  %v286_v2 = vmul.f32 %v283_v63, %v283_v63 }
 0x25a   :  { %v284_v3 = vsub.f32 %v268_v55, %v281_v1  ;;  %v289_v4 = vsel %vm30_vm0, %v286_v2, 0.0 }
 0x25b   :  { %290 = vadd.xlane.f32.xlu1 %v289_v4  ;;  %v278_v5 = vpop.xlane.xlu1 %277 }
 0x25c   :  { %v282_v6 = vmul.f32 0.03125, %v278_v5  ;;  %v287_v7 = vmul.f32 %v284_v3, %v284_v3 }
 0x25e   :  { %v285_v8 = vsub.f32 %v269_v59, %v282_v6  ;;  %v292_v9 = vsel %vm30_vm0, %v287_v7, 0.0 }
 0x25f   :  { %293 = vadd.xlane.f32.xlu0 %v292_v9 }
 0x260   :  { %v288_v10 = vmul.f32 %v285_v8, %v285_v8 }
 0x262   :  { %v295_v11 = vsel %vm30_vm0, %v288_v10, 0.0 }
 0x263   :  { %296 = vadd.xlane.f32.xlu1 %v295_v11 }
 0x2e8   :  { %v291_v12 = vpop.xlane.xlu1 %290 }
 0x2e9   :  { %v298_v13 = vmul.f32 0.03125, %v291_v12 }
 0x2eb   :  { %v301_v14 = vadd.f32 1e-05, %v298_v13 }
 0x2ec   :  { %v294_v15 = vpop.xlane.xlu0 %293 }
 0x2ed   :  { %428 = vrsqrt.f32 %v301_v14  ;;  %v299_v16 = vmul.f32 0.03125, %v294_v15 }
 0x2ef   :  { %v302_v17 = vadd.f32 1e-05, %v299_v16 }
 0x2f0   :  { %v297_v18 = vpop.xlane.xlu1 %296 }
 0x2f1   :  { %430 = vrsqrt.f32 %v302_v17  ;;  %v300_v19 = vmul.f32 0.03125, %v297_v18 }
 0x2f3   :  { %v303_v20 = vadd.f32 1e-05, %v300_v19 }
 0x2f5   :  { %432 = vrsqrt.f32 %v303_v20 }
 0x2f7   :  { %v429_v21 = vpop.eup %428 }
 0x2f8   :  { %v307_v23 = vmul.f32 %v429_v21, %v283_v63 }
 0x2fa   :  { %v317_v25 = vmul.f32 %v345_v22, %v307_v23 }
 0x2fb   :  { %v431_v26 = vpop.eup %430 }
 0x2fc   :  { %v327_v27 = vadd.f32 %v346_v24, %v317_v25  ;;  %v308_v28 = vmul.f32 %v431_v26, %v284_v3 }
 0x2fe   :  { %330 = vst.msk [vmem:[%s574_s7] sm:$0xff] %vm30_vm0, %v327_v27  ;;  %v318_v29 = vmul.f32 %v345_v22, %v308_v28 }
 0x2ff   :  { %v433_v30 = vpop.eup %432 }
 0x300   :  { %v328_v31 = vadd.f32 %v346_v24, %v318_v29  ;;  %v309_v32 = vmul.f32 %v433_v30, %v285_v8 }
 0x302   :  { %331 = vst.msk [vmem:[%s574_s7 + $0x8] sm:$0xff] %vm30_vm0, %v328_v31  ;;  %v319_v33 = vmul.f32 %v345_v22, %v309_v32 }
 0x304   :  { %v329_v34 = vadd.f32 %v346_v24, %v319_v33 }
 0x306   :  { %332 = vst.msk [vmem:[%s574_s7 + $0x10] sm:$0xff] %vm30_vm0, %v329_v34 }

// kernel: flash_scgpt_layer.5
= control target key start
LH: loop header
LB: loop body
LE: loop exit
PB: predicated region body
PF: predicated region fallthrough
CT: control target
= control target key end

     0   :  { %s1546_s21 = smov 0   ;;  %s1671_s0 = inlined_call_operand.vmem [shape: f32[2,12,96], index: 0, kind: input, shape index: {}]   ;;  %s1672_s1 = inlined_call_operand.vmem [shape: f32[2,8,32], index: 1, kind: input, shape index: {}]   ;;  %s1673_s2 = inlined_call_operand.vmem [shape: f32[32,32], index: 2, kind: input, shape index: {}]   ;;  %s1674_s3 = inlined_call_operand.vmem [shape: f32[1,32], index: 3, kind: input, shape index: {}]   ;;  %s1675_s4 = inlined_call_operand.vmem [shape: f32[1,32], index: 4, kind: input, shape index: {}]   ;;  %s1676_s5 = inlined_call_operand.vmem [shape: f32[1,32], index: 5, kind: input, shape index: {}]   ;;  %s1677_s6 = inlined_call_operand.vmem [shape: f32[2,8,32], index: 6, kind: output, shape index: {}]  }
   0x1 LB: > { %s1336_s22 = sadd.s32 4294967295, %s1496_s21   ;;  %p1340_p0 = scmp.ge.s32.totalorder %s1496_s21, 1  ;;  %s1496_s21 = sphi %s1546_s21, %s16_s21  }
   0x2   : > { %p221_p1 = scmp.lt.s32.totalorder %s1496_s21, 3 }
   0x4   : > { %p222_p2 = pnand %p1340_p0, %p221_p1 }
   0x5   : > { %p254_p3 = scmp.lt.s32.totalorder (!%p222_p2), %s1336_s22, 1  ;;  %v1498_v0 = vmov (!%p222_p2), 0.0   ;;  %vm1499_vm0 = vmmov (!%p222_p2), 0   ;;  %s1500_s27 = smov (!%p222_p2), 96   ;;  %vm277_vm1 = vcmask (!%p222_p2), 64512   ;;  %v268_v26 = vld [vmem:[%s1673_s2] sm:$0xff] (!%p222_p2) }
   0x6   : > { %225 = sbr.rel (%p222_p2) target bundleno = 2682 (0xa7a), region = 44  ;;  %1391 = vmatprep.subr.mxu0 (!%p222_p2), %v1498_v0  ;;  %1393 = vmatprep.mubr.msk.f32.mxu0 (!%p222_p2), %vm1499_vm0, %v1498_v0  ;;  %s1501_s28 = smov (!%p222_p2), 120   ;;  %v269_v35 = vld [vmem:[%s1673_s2 + $0x8] sm:$0xff] (!%p222_p2)  ;;  %v1349_v48 = vld [vmem:[%s1674_s3] ss:$0 sm:$0xff] (!%p222_p2)  ;;  %v270_v59 = vld [vmem:[%s1673_s2 + $0x10] sm:$0xff] (!%p222_p2) }
   0x7   : > { %1396 = vmatprep.subr.mxu1 (!%p222_p2), %v1498_v0  ;;  %1398 = vmatprep.mubr.msk.f32.mxu1 (!%p222_p2), %vm1499_vm0, %v1498_v0  ;;  %s1502_s29 = smov (!%p222_p2), 88   ;;  %s1503_s30 = smov (!%p222_p2), 64   ;;  %vm1239_vm2 = vcmask (!%p222_p2), 261120  }
   0x8   : > { %s1504_s7 = smov (!%p222_p2), 56   ;;  %s1505_s8 = smov (!%p222_p2), 80  }
   0x9   : > { %s1506_s9 = smov (!%p222_p2), 112   ;;  %s1507_s14 = smov (!%p222_p2), 72  }
   0xa   : > { %s1508_s15 = smov (!%p222_p2), 104   ;;  %s1509_s16 = smov (!%p222_p2), 48  }
   0xd   : > { %s1679_s22 = smov (!%p254_p3, %s1336_s22), 1 }
   0xe   : > { %s1366_s23 = sshll.u32 %s1679_s22, 4 }
   0xf   : > { %s258_s26 = scalar_lea.vmem %s1671_s0, %s1366_s23  ;;  %s1510_s23 = smov 40  }
  0x10   : > { %v1566_v1 = vld [vmem:[%s258_s26] sm:$0xff]  ;;  %s1343_s26 = sshll.u32 %s1679_s22, 3 }
  0x11   : > { %275 = vrot.lane.b32.xlu0 %v1566_v1, %s1500_s27  ;;  %v1570_v2 = vmul.f32 0.35355338, %v1566_v1  ;;  %s266_s11 = scalar_lea.vmem %s1677_s6, %s1343_s26 }
  0x13   : > { %520 = vrot.lane.b32.xlu1 %v1570_v2, %s1501_s28 }
  0x15   : > { %522 = vrot.lane.b32.xlu0 %v1566_v1, %s1502_s29  ;;  %s262_s29 = scalar_lea.vmem %s1672_s1, %s1343_s26 }
  0x83   : > { %v276_v3 = vpop.permute.xlu0 %275 }
  0x84   : > { %1392 = vmatpush3.xpose.msk.msra.mxu0 %vm277_vm1, %v276_v3 }
  0x85   : > { %1406 = vmatprep.subr.mxu0 %v1498_v0  ;;  %v521_v5 = vpop.permute.xlu1 %520 }
  0x87   : > { %v523_v4 = vpop.permute.xlu0 %522  ;;  %1394 = vmatmul.mubr.msk.f32.vlgmr.msra.gmra.mrb[0].mxu0 %vm277_vm1, %v1570_v2 }
  0x88   : > { %1407 = vmatpush3.xpose.msk.msra.mxu0 %vm277_vm1, %v523_v4  ;;  %1408 = vmatprep.mubr.msk.f32.mxu0 %vm1499_vm0, %v1498_v0 }
  0x89   : > { %1416 = vmatprep.subr.mxu0 %v1498_v0 }
  0x8b   : > { %1409 = vmatmul.mubr.msk.f32.vlgmr.msra.gmra.mrb[2].mxu0 %vm277_vm1, %v521_v5 }
  0x8c   : > { %1418 = vmatprep.mubr.msk.f32.mxu0 %vm1499_vm0, %v1498_v0  ;;  %1417 = vmatpush3.msra.mxu0 %v269_v35 }
  0x8d   : > { %1426 = vmatprep.subr.mxu0 %v1498_v0 }
 0x15a   : > { %v349_v6 = vpop.f32.mrb[0].mxu0 }
 0x15b   : > { %v1395_v7 = vpop.f32.mrb[1].mxu0  ;;  %v353_v8 = vsel %vm277_vm1, %v349_v6, -inf }
 0x15c   : > { %354 = vmax.xlane.f32.xlu1 %v353_v8 }
 0x15e   : > { %v594_v9 = vpop.f32.mrb[2].mxu0 }
 0x15f   : > { %v598_v10 = vsel %vm277_vm1, %v594_v9, -inf  ;;  %v1410_v11 = vpop.f32.mrb[3].mxu0 }
 0x160   : > { %599 = vmax.xlane.f32.xlu1 %v598_v10 }
 0x1e9   : > { %v355_v12 = vpop.xlane.xlu1 %354 }
 0x1ea   : > { %v356_v13 = vsub.f32 %v349_v6, %v355_v12 }
 0x1ec   : > { %v357_v14 = vmul.f32 1.442695, %v356_v13 }
 0x1ed   : > { %v600_v15 = vpop.xlane.xlu1 %599 }
 0x1ee   : > { %1472 = vpow2.f32 %v357_v14  ;;  %v601_v16 = vsub.f32 %v594_v9, %v600_v15 }
 0x1f0   : > { %v602_v17 = vmul.f32 1.442695, %v601_v16 }
 0x1f2   : > { %1474 = vpow2.f32 %v602_v17  ;;  %v1237_v17 = vld [vmem:[%s262_s29] sm:$0xff] }
 0x1f8   : > { %v1473_v18 = vpop.eup %1472 }
 0x1f9   : > { %v359_v19 = vsel %vm277_vm1, %v1473_v18, 0.0 }
 0x1fa   : > { %360 = vadd.xlane.f32.xlu0 %v359_v19 }
 0x1fc   : > { %v1475_v20 = vpop.eup %1474 }
 0x1fd   : > { %v604_v21 = vsel %vm277_vm1, %v1475_v20, 0.0 }
 0x1fe   : > { %605 = vadd.xlane.f32.xlu1 %v604_v21 }
 0x20f   : > { %609 = vrot.lane.b32.xlu1 %v1566_v1, %s1504_s7 }
 0x210   : > { %364 = vrot.lane.b32.xlu0 %v1566_v1, %s1503_s30 }
 0x214   : > { %761 = vrot.lane.b32.xlu0 %v1566_v1, %s1505_s8 }
 0x218   : > { %759 = vrot.lane.b32.xlu0 %v1570_v2, %s1506_s9 }
 0x287   : > { %v361_v22 = vpop.xlane.xlu0 %360 }
 0x288   : > { %1476 = vrcp.f32 %v361_v22 }
 0x28b   : > { %v365_v23 = vpop.permute.xlu0 %364  ;;  %v606_v27 = vpop.xlane.xlu1 %605 }
 0x28c   : > { %1397 = vmatpush3.msra.mxu1 %v365_v23  ;;  %1478 = vrcp.f32 %v606_v27 }
 0x28d   : > { %1401 = vmatprep.subr.mxu1 %v1498_v0 }
 0x28f   : > { %v610_v28 = vpop.permute.xlu1 %609  ;;  %v762_v33 = vpop.permute.xlu0 %761 }
 0x292   : > { %v1477_v24 = vpop.eup %1476 }
 0x293   : > { %v363_v25 = vmul.f32 %v1477_v24, %v1473_v18  ;;  %v760_v34 = vpop.permute.xlu0 %759 }
 0x295   : > { %1399 = vmatmul.mubr.msk.f32.vlgmr.msra.gmra.mrb[0].mxu1 %vm277_vm1, %v363_v25 }
 0x296   : > { %1402 = vmatpush3.msra.mxu1 %v268_v26  ;;  %1403 = vmatprep.mubr.msk.f32.mxu1 %vm1499_vm0, %v1498_v0  ;;  %v1479_v29 = vpop.eup %1478 }
 0x297   : > { %1411 = vmatprep.subr.mxu1 %v1498_v0  ;;  %v608_v32 = vmul.f32 %v1479_v29, %v1475_v20 }
 0x368   : > { %v436_v30 = vpop.f32.mrb[0].mxu1 }
 0x369   : > { %v1400_v31 = vpop.f32.mrb[1].mxu1  ;;  %1404 = vmatmul.mubr.msk.f32.vlgmr.msra.gmra.mrb[2].mxu1 %vm277_vm1, %v436_v30 }
 0x36a   : > { %1412 = vmatpush3.msra.mxu1 %v610_v28  ;;  %1413 = vmatprep.mubr.msk.f32.mxu1 %vm1499_vm0, %v1498_v0  ;;  %v1362_v31 = vld [vmem:[%s1675_s4] ss:$0 sm:$0xff] }
 0x36b   : > { %1421 = vmatprep.subr.mxu1 %v1498_v0 }
 0x36d   : > { %1414 = vmatmul.mubr.msk.f32.vlgmr.msra.gmra.mrb[4].mxu1 %vm277_vm1, %v608_v32 }
 0x36e   : > { %1423 = vmatprep.mubr.msk.f32.mxu1 %vm1499_vm0, %v1498_v0 }
 0x371   : > { %1422 = vmatpush3.xpose.msk.msra.mxu1 %vm277_vm1, %v762_v33  ;;  %v1363_v33 = vld [vmem:[%s1676_s5] ss:$0 sm:$0xff] }
 0x372   : > { %1431 = vmatprep.subr.mxu1 %v1498_v0 }
 0x374   : > { %1424 = vmatmul.mubr.msk.f32.vlgmr.msra.gmra.mrb[6].mxu1 %vm277_vm1, %v760_v34 }
 0x375   : > { %1433 = vmatprep.mubr.msk.f32.mxu1 %vm1499_vm0, %v1498_v0  ;;  %1432 = vmatpush3.msra.mxu1 %v270_v59 }
 0x376   : > { %1441 = vmatprep.subr.mxu1 %v1498_v0 }
 0x43c   : > { %v509_v36 = vpop.f32.mrb[2].mxu1 }
 0x43d   : > { %v1405_v37 = vpop.f32.mrb[3].mxu1  ;;  %v519_v49 = vadd.f32 %v1349_v48, %v509_v36 }
 0x440   : > { %v681_v38 = vpop.f32.mrb[4].mxu1 }
 0x441   : > { %v1415_v39 = vpop.f32.mrb[5].mxu1  ;;  %1419 = vmatmul.mubr.msk.f32.vlgmr.msra.gmra.mrb[4].mxu0 %vm277_vm1, %v681_v38 }
 0x442   : > { %1428 = vmatprep.mubr.msk.f32.mxu0 %vm1499_vm0, %v1498_v0 }
 0x447   : > { %v833_v40 = vpop.f32.mrb[6].mxu1 }
 0x448   : > { %v1425_v41 = vpop.f32.mrb[7].mxu1  ;;  %v837_v42 = vsel %vm277_vm1, %v833_v40, -inf }
 0x449   : > { %838 = vmax.xlane.f32.xlu1 %v837_v42 }
 0x45a   : > { %1000 = vrot.lane.b32.xlu1 %v1566_v1, %s1507_s14 }
 0x45e   : > { %998 = vrot.lane.b32.xlu1 %v1570_v2, %s1508_s15 }
 0x4d6   : > { %v839_v43 = vpop.xlane.xlu1 %838 }
 0x4d7   : > { %v840_v44 = vsub.f32 %v833_v40, %v839_v43 }
 0x4d9   : > { %v841_v45 = vmul.f32 1.442695, %v840_v44 }
 0x4da   : > { %v1001_v55 = vpop.permute.xlu1 %1000 }
 0x4db   : > { %1480 = vpow2.f32 %v841_v45 }
 0x4de   : > { %v999_v58 = vpop.permute.xlu1 %998 }
 0x4e5   : > { %v1481_v46 = vpop.eup %1480 }
 0x4e6   : > { %v843_v47 = vsel %vm277_vm1, %v1481_v46, 0.0 }
 0x4e7   : > { %844 = vadd.xlane.f32.xlu0 %v843_v47 }
 0x4fd   : > { %848 = vrot.lane.b32.xlu0 %v1566_v1, %s1509_s16 }
 0x514   : > { %v754_v50 = vpop.f32.mrb[4].mxu0 }
 0x515   : > { %v758_v51 = vadd.f32 %v754_v50, %v519_v49  ;;  %v1420_v52 = vpop.f32.mrb[5].mxu0 }
 0x574   : > { %v845_v53 = vpop.xlane.xlu0 %844 }
 0x575   : > { %1482 = vrcp.f32 %v845_v53 }
 0x578   : > { %v849_v54 = vpop.permute.xlu0 %848 }
 0x579   : > { %1427 = vmatpush3.msra.mxu0 %v849_v54 }
 0x57a   : > { %1436 = vmatprep.subr.mxu0 %v1498_v0 }
 0x57f   : > { %v1483_v56 = vpop.eup %1482 }
 0x580   : > { %v847_v57 = vmul.f32 %v1483_v56, %v1481_v46 }
 0x582   : > { %1429 = vmatmul.mubr.msk.f32.vlgmr.msra.gmra.mrb[6].mxu0 %vm277_vm1, %v847_v57 }
 0x583   : > { %1437 = vmatpush3.xpose.msk.msra.mxu0 %vm277_vm1, %v1001_v55  ;;  %1438 = vmatprep.mubr.msk.f32.mxu0 %vm1499_vm0, %v1498_v0 }
 0x584   : > { %1446 = vmatprep.subr.mxu0 %v1498_v0 }
 0x586   : > { %1439 = vmatmul.mubr.msk.f32.vlgmr.msra.gmra.mrb[8].mxu0 %vm277_vm1, %v999_v58 }
 0x587   : > { %1448 = vmatprep.mubr.msk.f32.mxu0 %vm1499_vm0, %v1498_v0 }
 0x655   : > { %v920_v60 = vpop.f32.mrb[6].mxu0 }
 0x656   : > { %v1430_v61 = vpop.f32.mrb[7].mxu0  ;;  %1434 = vmatmul.mubr.msk.f32.vlgmr.msra.gmra.mrb[8].mxu1 %vm277_vm1, %v920_v60 }
 0x657   : > { %1443 = vmatprep.mubr.msk.f32.mxu1 %vm1499_vm0, %v1498_v0  ;;  %v271_v0 = vld [vmem:[%s1673_s2 + $0x18] sm:$0xff] }
 0x658   : > { %1447 = vmatpush3.msra.mxu0 %v271_v0 }
 0x659   : > { %v1072_v62 = vpop.f32.mrb[8].mxu0 }
 0x65a   : > { %v1440_v63 = vpop.f32.mrb[9].mxu0  ;;  %v1076_v2 = vsel %vm277_vm1, %v1072_v62, -inf }
 0x65b   : > { %1077 = vmax.xlane.f32.xlu0 %v1076_v2 }
 0x671   : > { %1087 = vrot.lane.b32.xlu0 %v1566_v1, %s1510_s23 }
 0x6e8   : > { %v1078_v3 = vpop.xlane.xlu0 %1077 }
 0x6e9   : > { %v1079_v4 = vsub.f32 %v1072_v62, %v1078_v3 }
 0x6eb   : > { %v1080_v5 = vmul.f32 1.442695, %v1079_v4 }
 0x6ec   : > { %v1088_v8 = vpop.permute.xlu0 %1087 }
 0x6ed   : > { %1484 = vpow2.f32 %v1080_v5  ;;  %1442 = vmatpush3.msra.mxu1 %v1088_v8 }
 0x6f7   : > { %v1485_v6 = vpop.eup %1484 }
 0x6f8   : > { %v1082_v7 = vsel %vm277_vm1, %v1485_v6, 0.0 }
 0x6f9   : > { %1083 = vadd.xlane.f32.xlu1 %v1082_v7 }
 0x729   : > { %v993_v9 = vpop.f32.mrb[8].mxu1 }
 0x72a   : > { %v997_v10 = vadd.f32 %v993_v9, %v758_v51  ;;  %v1435_v11 = vpop.f32.mrb[9].mxu1 }
 0x786   : > { %v1084_v1 = vpop.xlane.xlu1 %1083 }
 0x787   : > { %1486 = vrcp.f32 %v1084_v1 }
 0x791   : > { %v1487_v12 = vpop.eup %1486 }
 0x792   : > { %v1086_v13 = vmul.f32 %v1487_v12, %v1485_v6 }
 0x794   : > { %1444 = vmatmul.mubr.msk.f32.vlgmr.msra.gmra.mrb[10].mxu1 %vm277_vm1, %v1086_v13 }
 0x867   : > { %v1159_v14 = vpop.f32.mrb[10].mxu1 }
 0x868   : > { %v1445_v15 = vpop.f32.mrb[11].mxu1  ;;  %1449 = vmatmul.mubr.msk.f32.vlgmr.msra.gmra.mrb[10].mxu0 %vm277_vm1, %v1159_v14 }
 0x93b   : > { %v1232_v16 = vpop.f32.mrb[10].mxu0 }
 0x93c   : > { %v1236_v18 = vadd.f32 %v1232_v16, %v997_v10  ;;  %v1450_v19 = vpop.f32.mrb[11].mxu0 }
 0x93e   : > { %v1238_v20 = vadd.f32 %v1237_v17, %v1236_v18 }
 0x940   : > { %v1240_v21 = vsel %vm1239_vm2, %v1238_v20, 0.0 }
 0x941   : > { %1241 = vadd.xlane.f32.xlu1 %v1240_v21 }
 0x9ce   : > { %v1242_v22 = vpop.xlane.xlu1 %1241 }
 0x9cf   : > { %v1244_v23 = vmul.f32 0.03125, %v1242_v22 }
 0x9d1   : > { %v1245_v24 = vsub.f32 %v1238_v20, %v1244_v23 }
 0x9d3   : > { %v1246_v25 = vmul.f32 %v1245_v24, %v1245_v24 }
 0x9d5   : > { %v1247_v26 = vsel %vm1239_vm2, %v1246_v25, 0.0 }
 0x9d6   : > { %1248 = vadd.xlane.f32.xlu1 %v1247_v26 }
 0xa63   : > { %v1249_v27 = vpop.xlane.xlu1 %1248 }
 0xa64   : > { %v1250_v28 = vmul.f32 0.03125, %v1249_v27 }
 0xa66   : > { %v1251_v29 = vadd.f32 1e-05, %v1250_v28 }
 0xa68   : > { %1488 = vrsqrt.f32 %v1251_v29 }
 0xa72   : > { %v1489_v30 = vpop.eup %1488 }
 0xa73   : > { %v1253_v32 = vmul.f32 %v1489_v30, %v1245_v24 }
 0xa75   : > { %v1261_v34 = vmul.f32 %v1362_v31, %v1253_v32 }
 0xa77   : > { %v1269_v35 = vadd.f32 %v1363_v33, %v1261_v34 }
 0xa79   : > { %1270 = vst.msk [vmem:[%s266_s11] sm:$0xff] %vm1239_vm2, %v1269_v35 }
 0xa7a PF: > { %s16_s21 = sadd.s32 1, %s1496_s21  }
 0xa7b   : > { %p13_p4 = scmp.ge.s32.totalorder %s16_s21, 4  }
 0xa7d   :  { %15 = sbr.rel (!%p13_p4) target bundleno = 1 (0x1), region = 77 }

// kernel: flash_scgpt_layer.6
= control target key start
LH: loop header
LB: loop body
LE: loop exit
PB: predicated region body
PF: predicated region fallthrough
CT: control target
= control target key end

     0   :  { %s2121_s27 = smov 0   ;;  %s2316_s0 = inlined_call_operand.vmem [shape: f32[2,12,96], index: 0, kind: input, shape index: {}]   ;;  %s2317_s1 = inlined_call_operand.vmem [shape: f32[2,4,32], index: 1, kind: input, shape index: {}]   ;;  %s2318_s2 = inlined_call_operand.vmem [shape: f32[32,96], index: 2, kind: input, shape index: {}]   ;;  %s2319_s3 = inlined_call_operand.vmem [shape: f32[1,96], index: 3, kind: input, shape index: {}]   ;;  %s2320_s4 = inlined_call_operand.vmem [shape: f32[32,32], index: 4, kind: input, shape index: {}]   ;;  %s2321_s5 = inlined_call_operand.vmem [shape: f32[1,32], index: 5, kind: input, shape index: {}]   ;;  %s2322_s6 = inlined_call_operand.vmem [shape: f32[1,32], index: 6, kind: input, shape index: {}]   ;;  %s2323_s7 = inlined_call_operand.vmem [shape: f32[1,32], index: 7, kind: input, shape index: {}]   ;;  %s2324_s8 = inlined_call_operand.vmem [shape: f32[2,4,32], index: 8, kind: output, shape index: {}]  }
   0x1 LB: > { %s1715_s28 = sadd.s32 4294967295, %s2064_s27   ;;  %p1719_p0 = scmp.ge.s32.totalorder %s2064_s27, 1  ;;  %s2064_s27 = sphi %s2121_s27, %s18_s27  }
   0x2   : > { %p271_p1 = scmp.lt.s32.totalorder %s2064_s27, 3 }
   0x4   : > { %p272_p2 = pnand %p1719_p0, %p271_p1 }
   0x5   : > { %v323_v0 = vld [vmem:[%s2318_s2] sm:$0xff] (!%p272_p2)  ;;  %v324_v1 = vld [vmem:[%s2318_s2 + $0x8] sm:$0xff] (!%p272_p2)  ;;  %v325_v2 = vld [vmem:[%s2318_s2 + $0x10] sm:$0xff] (!%p272_p2)  ;;  %p308_p3 = scmp.lt.s32.totalorder (!%p272_p2), %s1715_s28, 1  ;;  %v2066_v6 = vmov (!%p272_p2), 0.0|0.0   ;;  %s2067_s15 = smov (!%p272_p2), 96   ;;  %v610_v45 = vlaneseq (!%p272_p2) }
   0x6   : > { %275 = sbr.rel (%p272_p2) target bundleno = 2699 (0xa8b), region = 52  ;;  %v1990_v3 = vpack.i.bf16 (!%p272_p2), %v324_v1, %v323_v0  ;;  %v326_v4 = vld [vmem:[%s2318_s2 + $0x18] sm:$0xff] (!%p272_p2)  ;;  %v1919_v5 = vpack.c.bf16 (!%p272_p2), %v324_v1, %v323_v0  ;;  %1918 = vmatprep.subr.bf16.mxu0 (!%p272_p2), %v2066_v6  ;;  %vm2068_vm0 = vmmov (!%p272_p2), 0   ;;  %v2069_v9 = vmov (!%p272_p2), 0.0   ;;  %v2154_v12 = vld [vmem:[%s2319_s3] ss:$0 sm:$0xff] (!%p272_p2) }
   0x7   : > { %v1995_v7 = vpack.i.bf16 (!%p272_p2), %v326_v4, %v325_v2  ;;  %v1922_v8 = vpack.c.bf16 (!%p272_p2), %v326_v4, %v325_v2  ;;  %1817 = vmatprep.mubr.msk.f32.mxu0 (!%p272_p2), %vm2068_vm0, %v2069_v9  ;;  %vm334_vm1 = vcmask (!%p272_p2), 261120   ;;  %s2070_s22 = smov (!%p272_p2), 64   ;;  %vm624_vm2 = vcmask (!%p272_p2), 64512   ;;  %s2072_s23 = smov (!%p272_p2), 120   ;;  %v620_v30 = vld [vmem:[%s2320_s4 + $0x8] sm:$0xff] (!%p272_p2) }
   0x8   : > { %1991 = vrot.lane.b32.xlu0 (!%p272_p2), %v1990_v3, %s2067_s15  ;;  %1920 = vmatpush3.bf16.msra.mxu0 (!%p272_p2), %v1919_v5  ;;  %vm2169_vm3 = vmpackc.low (!%p272_p2), %vm624_vm2, %vm624_vm2  ;;  %v611_v46 = vshrl.u32 (!%p272_p2), %v610_v45, 7  ;;  %v613_v47 = vand.u32 (!%p272_p2), 127, %v610_v45  ;;  %v2071_v49 = vmov (!%p272_p2), -1e+30   ;;  %vm704_vm7 = vcmask (!%p272_p2), 93184   ;;  %s2073_s24 = smov (!%p272_p2), 112  }
   0x9   : > { %1921 = vmatprep.subr.bf16.mxu0 (!%p272_p2), %v2066_v6  ;;  %vm720_vm8 = vcmask (!%p272_p2), 1043456   ;;  %vm2074_vm9 = vmmov (!%p272_p2), 1   ;;  %vm716_vm11 = vcmask (!%p272_p2), 97280   ;;  %s2075_s29 = smov (!%p272_p2), 104   ;;  %vm1618_vm12 = vcmask (!%p272_p2), 257024  }
   0xa   : > { %v615_v48 = vadd.s32 (!%p272_p2), 8, %v611_v46  ;;  %vm614_vm4 = vcmp.lt.s32.totalorder (!%p272_p2), %v613_v47, 8  ;;  %vm2205_vm10 = vmpackc.low (!%p272_p2), %vm720_vm8, %vm2074_vm9 }
   0xc   : > { %1996 = vrot.lane.b32.xlu0 (!%p272_p2), %v1995_v7, %s2067_s15  ;;  %1923 = vmatpush3.bf16.msra.mxu0 (!%p272_p2), %v1922_v8  ;;  %vm616_vm5 = vcmp.eq.s32.totalorder (!%p272_p2), %v613_v47, %v615_v48 }
   0xd   : > { %s2330_s28 = smov (!%p308_p3, %s1715_s28), 1  ;;  %vm617_vm6 = vmor %vm614_vm4, %vm616_vm5 }
   0xe   : > { %s1759_s16 = sshll.u32 %s2330_s28, 4  ;;  %v2190_v50 = vsel %vm617_vm6, 0.0, %v2071_v49 }
   0xf   : > { %s312_s19 = scalar_lea.vmem %s2316_s0, %s1759_s16  ;;  %s1722_s16 = sshll.u32 %s2330_s28, 2 }
  0x10   : > { %v321_v10 = vld [vmem:[%s312_s19] sm:$0xff]  ;;  %v322_v11 = vld [vmem:[%s312_s19 + $0x8] sm:$0xf]  ;;  %429 = vrot.lane.b32.xlu0 %v2154_v12, %s2067_s15  ;;  %s316_s19 = scalar_lea.vmem %s2317_s1, %s1722_s16  ;;  %s320_s25 = scalar_lea.vmem %s2324_s8, %s1722_s16 }
  0x11   : > { %409 = vrot.lane.b32.xlu1 %v321_v10, %s2067_s15  ;;  %1818 = vmatmul.mubr.msk.f32.vlgmr.msra.gmra.mrb[0].mxu0 %vm334_vm1, %v322_v11 }
  0x14   : > { %2006 = vrot.lane.b32.xlu0 %v1995_v7, %s2070_s22 }
  0x15   : > { %411 = vrot.lane.b32.xlu1 %v322_v11, %s2067_s15 }
  0x18   : > { %513 = vrot.lane.b32.xlu0 %v322_v11, %s2070_s22 }
  0x19   : > { %2001 = vrot.lane.b32.xlu1 %v1990_v3, %s2070_s22 }
  0x1d   : > { %511 = vrot.lane.b32.xlu1 %v321_v10, %s2070_s22 }
  0x7a   : > { %v1992_v13 = vpop.permute.xlu0 %1991 }
  0x7b   : > { %v1994_v14 = vunpack.i.h.bf16 %v1992_v13  ;;  %v1993_v15 = vunpack.i.l.bf16 %v1992_v13 }
  0x7d   : > { %v1924_v16 = vpack.c.bf16 %v1994_v14, %v1993_v15 }
  0x7e   : > { %v1997_v17 = vpop.permute.xlu0 %1996 }
  0x7f   : > { %v1999_v19 = vunpack.i.h.bf16 %v1997_v17  ;;  %v1998_v20 = vunpack.i.l.bf16 %v1997_v17  ;;  %1925 = vmatprep.subr.bf16.mxu1 %v1924_v16 }
  0x80   : > { %1927 = vmatpush3.bf16.msra.mxu1 %v1924_v16 }
  0x81   : > { %v1928_v21 = vpack.c.bf16 %v1999_v19, %v1998_v20  ;;  %v619_v19 = vld [vmem:[%s2320_s4] sm:$0xff] }
  0x82   : > { %v430_v25 = vpop.permute.xlu0 %429 }
  0x83   : > { %v410_v18 = vpop.permute.xlu1 %409  ;;  %1929 = vmatprep.subr.bf16.mxu1 %v1928_v21 }
  0x84   : > { %1828 = vmatprep.mubr.msk.f32.mxu1 %vm334_vm1, %v410_v18  ;;  %1931 = vmatpush3.bf16.msra.mxu1 %v1928_v21 }
  0x85   : > { %1940 = vmatprep.subr.bf16.mxu1 %v2066_v6 }
  0x86   : > { %v2007_v36 = vpop.permute.xlu0 %2006 }
  0x87   : > { %v412_v22 = vpop.permute.xlu1 %411  ;;  %v2009_v39 = vunpack.i.h.bf16 %v2007_v36  ;;  %v2008_v40 = vunpack.i.l.bf16 %v2007_v36 }
  0x88   : > { %1829 = vmatmul.mubr.msk.f32.vlgmr.msra.gmra.mrb[0].mxu1 %vm334_vm1, %v412_v22 }
  0x89   : > { %1846 = vmatprep.mubr.msk.f32.mxu1 %vm2068_vm0, %v2069_v9  ;;  %v1936_v42 = vpack.c.bf16 %v2009_v39, %v2008_v40 }
  0x8a   : > { %v514_v44 = vpop.permute.xlu0 %513 }
  0x8b   : > { %v2002_v35 = vpop.permute.xlu1 %2001 }
  0x8c   : > { %v2004_v37 = vunpack.i.h.bf16 %v2002_v35  ;;  %v2003_v38 = vunpack.i.l.bf16 %v2002_v35 }
  0x8e   : > { %v1932_v41 = vpack.c.bf16 %v2004_v37, %v2003_v38 }
  0x8f   : > { %v512_v43 = vpop.permute.xlu1 %511 }
  0x90   : > { %1933 = vmatprep.subr.bf16.mxu0 %v1932_v41  ;;  %1839 = vmatprep.mubr.msk.f32.mxu0 %vm334_vm1, %v512_v43 }
  0x91   : > { %1935 = vmatpush3.bf16.msra.mxu0 %v1932_v41 }
  0x92   : > { %1937 = vmatprep.subr.bf16.mxu0 %v1936_v42 }
  0x95   : > { %1939 = vmatpush3.bf16.msra.mxu0 %v1936_v42 }
  0x96   : > { %1944 = vmatprep.subr.bf16.mxu0 %v2066_v6 }
  0x98   : > { %1840 = vmatmul.mubr.msk.f32.vlgmr.msra.gmra.mrb[2].mxu0 %vm334_vm1, %v514_v44 }
  0x99   : > { %1853 = vmatprep.mubr.msk.f32.mxu0 %vm2068_vm0, %v2069_v9 }
  0xe4   : > { %v404_v23 = vpop.f32.mrb[0].mxu0 }
  0xe5   : > { %v1819_v24 = vpop.f32.mrb[1].mxu0  ;;  %v405_v33 = vadd.f32 %v2154_v12, %v404_v23 }
  0xe7   : > { %v2179_v34 = vmul.f32 0.35355338, %v405_v33 }
 0x15b   : > { %v1830_v26 = vpop.f32.mrb[0].mxu1 }
 0x15c   : > { %v508_v27 = vadd.f32 %v1830_v26, %v430_v25  ;;  %v502_v28 = vpop.f32.mrb[1].mxu1 }
 0x15d   : > { %v503_v29 = vadd.f32 %v502_v28, %v430_v25 }
 0x15f   : > { %v1941_v31 = vpack.c.bf16 %v508_v27, %v503_v29  ;;  %v2173_v32 = vpack.i.bf16 %v508_v27, %v503_v29 }
 0x161   : > { %1943 = vmatpush3.bf16.xpose.msk.msra.mxu1 %vm2169_vm3, %v1941_v31 }
 0x162   : > { %1856 = vmatprep.subr.mxu1 %v2069_v9 }
 0x168   : > { %1847 = vmatmul.mubr.msk.f32.vlgmr.msra.gmra.mrb[2].mxu1 %vm624_vm2, %v2179_v34 }
 0x169   : > { %1858 = vmatprep.mubr.msk.f32.mxu1 %vm2068_vm0, %v2069_v9  ;;  %1857 = vmatpush3.msra.mxu1 %v619_v19 }
 0x16a   : > { %1952 = vmatprep.subr.bf16.mxu1 %v2066_v6 }
 0x16b   : > { %v1841_v60 = vpop.f32.mrb[2].mxu0 }
 0x16c   : > { %v600_v61 = vpop.f32.mrb[3].mxu0 }
 0x23b   : > { %v700_v51 = vpop.f32.mrb[2].mxu1 }
 0x23c   : > { %v701_v52 = vadd.f32 %v700_v51, %v2190_v50  ;;  %v1848_v53 = vpop.f32.mrb[3].mxu1 }
 0x23e   : > { %v705_v54 = vsel %vm704_vm7, %v701_v52, -inf }
 0x23f   : > { %706 = vmax.xlane.f32.xlu1 %v705_v54 }
 0x250   : > { %2011 = vrot.lane.b32.xlu1 %v2173_v32, %s2072_s23 }
 0x254   : > { %874 = vrot.lane.b32.xlu1 %v2179_v34, %s2072_s23 }
 0x258   : > { %1122 = vrot.lane.b32.xlu1 %v2179_v34, %s2073_s24 }
 0x2cc   : > { %v707_v55 = vpop.xlane.xlu1 %706 }
 0x2cd   : > { %v708_v56 = vsub.f32 %v701_v52, %v707_v55 }
 0x2cf   : > { %v709_v57 = vmul.f32 1.442695, %v708_v56 }
 0x2d0   : > { %v2012_v5 = vpop.permute.xlu1 %2011 }
 0x2d1   : > { %2040 = vpow2.f32 %v709_v57  ;;  %v2014_v8 = vunpack.i.h.bf16 %v2012_v5  ;;  %v2013_v10 = vunpack.i.l.bf16 %v2012_v5 }
 0x2d4   : > { %v875_v16 = vpop.permute.xlu1 %874 }
 0x2d8   : > { %v1123_v18 = vpop.permute.xlu1 %1122 }
 0x2db   : > { %v2041_v58 = vpop.eup %2040 }
 0x2dc   : > { %v711_v59 = vsel %vm704_vm7, %v2041_v58, 0.0 }
 0x2dd   : > { %712 = vadd.xlane.f32.xlu0 %v711_v59 }
 0x2f3   : > { %527 = vrot.lane.b32.xlu0 %v2154_v12, %s2070_s22  ;;  %v1949_v12 = vpack.c.bf16 %v2014_v8, %v2013_v10  ;;  %v621_v8 = vld [vmem:[%s2320_s4 + $0x10] sm:$0xff] }
 0x2f7   : > { %2016 = vrot.lane.b32.xlu0 %v2173_v32, %s2073_s24 }
 0x36a   : > { %v713_v62 = vpop.xlane.xlu0 %712 }
 0x36b   : > { %2042 = vrcp.f32 %v713_v62 }
 0x36e   : > { %v528_v63 = vpop.permute.xlu0 %527 }
 0x36f   : > { %v601_v0 = vadd.f32 %v600_v61, %v528_v63  ;;  %v606_v1 = vadd.f32 %v1841_v60, %v528_v63 }
 0x371   : > { %v1945_v3 = vpack.c.bf16 %v606_v1, %v601_v0  ;;  %v2209_v4 = vpack.i.bf16 %v606_v1, %v601_v0 }
 0x372   : > { %v2017_v13 = vpop.permute.xlu0 %2016 }
 0x373   : > { %1947 = vmatpush3.bf16.msk.msra.mxu0 %vm2205_vm10, %v1945_v3  ;;  %v2019_v14 = vunpack.i.h.bf16 %v2017_v13  ;;  %v2018_v15 = vunpack.i.l.bf16 %v2017_v13 }
 0x374   : > { %1948 = vmatprep.subr.bf16.mxu0 %v2066_v6 }
 0x375   : > { %v2043_v7 = vpop.eup %2042  ;;  %v1957_v17 = vpack.c.bf16 %v2019_v14, %v2018_v15  ;;  %v1736_v14 = vld [vmem:[%s2321_s5] ss:$0 sm:$0xff] }
 0x376   : > { %v715_v11 = vmul.f32 %v2043_v7, %v2041_v58 }
 0x378   : > { %1854 = vmatmul.mubr.msk.f32.vlgmr.msra.gmra.mrb[4].mxu0 %vm716_vm11, %v715_v11 }
 0x379   : > { %1865 = vmatprep.mubr.msk.f32.mxu0 %vm2068_vm0, %v2069_v9 }
 0x37c   : > { %1951 = vmatpush3.bf16.xpose.msk.msra.mxu0 %vm2169_vm3, %v1949_v12 }
 0x37d   : > { %1956 = vmatprep.subr.bf16.mxu0 %v2066_v6 }
 0x383   : > { %1866 = vmatmul.mubr.msk.f32.vlgmr.msra.gmra.mrb[6].mxu0 %vm624_vm2, %v875_v16 }
 0x384   : > { %1959 = vmatpush3.bf16.xpose.msk.msra.mxu0 %vm2169_vm3, %v1957_v17  ;;  %1884 = vmatprep.mubr.msk.f32.mxu0 %vm2068_vm0, %v2069_v9 }
 0x385   : > { %1964 = vmatprep.subr.bf16.mxu0 %v2066_v6 }
 0x38b   : > { %1885 = vmatmul.mubr.msk.f32.vlgmr.msra.gmra.mrb[8].mxu0 %vm624_vm2, %v1123_v18 }
 0x38c   : > { %1903 = vmatprep.mubr.msk.f32.mxu0 %vm2068_vm0, %v2069_v9 }
 0x44b   : > { %v790_v20 = vpop.f32.mrb[4].mxu0 }
 0x44c   : > { %v1855_v21 = vpop.f32.mrb[5].mxu0  ;;  %1859 = vmatmul.mubr.msk.f32.vlgmr.msra.gmra.mrb[4].mxu1 %vm624_vm2, %v790_v20 }
 0x44d   : > { %1872 = vmatprep.mubr.msk.f32.mxu1 %vm2068_vm0, %v2069_v9 }
 0x456   : > { %v952_v22 = vpop.f32.mrb[6].mxu0 }
 0x457   : > { %v953_v23 = vadd.f32 %v952_v22, %v2190_v50  ;;  %v1867_v24 = vpop.f32.mrb[7].mxu0 }
 0x459   : > { %v956_v25 = vsel %vm704_vm7, %v953_v23, -inf }
 0x45a   : > { %957 = vmax.xlane.f32.xlu0 %v956_v25 }
 0x45e   : > { %v1200_v26 = vpop.f32.mrb[8].mxu0 }
 0x45f   : > { %v1886_v27 = vpop.f32.mrb[9].mxu0  ;;  %v1201_v41 = vadd.f32 %v1200_v26, %v2190_v50  ;;  %v622_v26 = vld [vmem:[%s2320_s4 + $0x18] sm:$0xff] }
 0x461   : > { %v1204_v42 = vsel %vm704_vm7, %v1201_v41, -inf }
 0x470   : > { %2021 = vrot.lane.b32.xlu0 %v2209_v4, %s2072_s23 }
 0x474   : > { %1369 = vrot.lane.b32.xlu0 %v2179_v34, %s2075_s29 }
 0x4e7   : > { %v958_v28 = vpop.xlane.xlu0 %957 }
 0x4e8   : > { %v959_v29 = vsub.f32 %v953_v23, %v958_v28 }
 0x4ea   : > { %v960_v31 = vmul.f32 1.442695, %v959_v29 }
 0x4eb   : > { %v2022_v33 = vpop.permute.xlu0 %2021 }
 0x4ec   : > { %2044 = vpow2.f32 %v960_v31  ;;  %v2024_v35 = vunpack.i.h.bf16 %v2022_v33  ;;  %v2023_v36 = vunpack.i.l.bf16 %v2022_v33 }
 0x4ee   : > { %v1953_v37 = vpack.c.bf16 %v2024_v35, %v2023_v36  ;;  %v1616_v35 = vld [vmem:[%s316_s19] sm:$0xf] }
 0x4f0   : > { %1955 = vmatpush3.bf16.msk.msra.mxu1 %vm2205_vm10, %v1953_v37 }
 0x4f1   : > { %1875 = vmatprep.subr.mxu1 %v2069_v9 }
 0x4f6   : > { %v2045_v38 = vpop.eup %2044 }
 0x4f7   : > { %v962_v39 = vsel %vm704_vm7, %v2045_v38, 0.0 }
 0x4f8   : > { %963 = vadd.xlane.f32.xlu1 %v962_v39 }
 0x509   : > { %2026 = vrot.lane.b32.xlu1 %v2173_v32, %s2075_s29  ;;  %v1370_v32 = vpop.permute.xlu0 %1369 }
 0x51f   : > { %v863_v34 = vpop.f32.mrb[4].mxu1 }
 0x520   : > { %v1860_v40 = vpop.f32.mrb[5].mxu1  ;;  %v873_v15 = vadd.f32 %v1736_v14, %v863_v34 }
 0x52d   : > { %1205 = vmax.xlane.f32.xlu1 %v1204_v42 }
 0x585   : > { %v964_v43 = vpop.xlane.xlu1 %963 }
 0x586   : > { %2046 = vrcp.f32 %v964_v43 }
 0x589   : > { %v2027_v44 = vpop.permute.xlu1 %2026 }
 0x58a   : > { %v2029_v45 = vunpack.i.h.bf16 %v2027_v44  ;;  %v2028_v46 = vunpack.i.l.bf16 %v2027_v44 }
 0x58c   : > { %v1965_v47 = vpack.c.bf16 %v2029_v45, %v2028_v46 }
 0x58e   : > { %1967 = vmatpush3.bf16.xpose.msk.msra.mxu0 %vm2169_vm3, %v1965_v47  ;;  %v1755_v47 = vld [vmem:[%s2322_s6] ss:$0 sm:$0xff] }
 0x590   : > { %v2047_v48 = vpop.eup %2046 }
 0x591   : > { %v966_v49 = vmul.f32 %v2047_v48, %v2045_v38 }
 0x593   : > { %1873 = vmatmul.mubr.msk.f32.vlgmr.msra.gmra.mrb[6].mxu1 %vm716_vm11, %v966_v49  ;;  %v1756_v49 = vld [vmem:[%s2323_s7] ss:$0 sm:$0xff] }
 0x594   : > { %1877 = vmatprep.mubr.msk.f32.mxu1 %vm2068_vm0, %v2069_v9  ;;  %1876 = vmatpush3.msra.mxu1 %v620_v30 }
 0x595   : > { %1904 = vmatmul.mubr.msk.f32.vlgmr.msra.gmra.mrb[10].mxu0 %vm624_vm2, %v1370_v32  ;;  %1960 = vmatprep.subr.bf16.mxu1 %v2066_v6 }
 0x5ba   : > { %v1206_v51 = vpop.xlane.xlu1 %1205 }
 0x5bb   : > { %v1207_v52 = vsub.f32 %v1201_v41, %v1206_v51 }
 0x5bd   : > { %v1208_v53 = vmul.f32 1.442695, %v1207_v52 }
 0x5bf   : > { %2048 = vpow2.f32 %v1208_v53 }
 0x5c9   : > { %v2049_v54 = vpop.eup %2048 }
 0x5ca   : > { %v1210_v55 = vsel %vm704_vm7, %v2049_v54, 0.0 }
 0x5cb   : > { %1211 = vadd.xlane.f32.xlu0 %v1210_v55 }
 0x5e1   : > { %2031 = vrot.lane.b32.xlu0 %v2209_v4, %s2073_s24 }
 0x658   : > { %v1212_v56 = vpop.xlane.xlu0 %1211 }
 0x659   : > { %2050 = vrcp.f32 %v1212_v56 }
 0x65c   : > { %v2032_v57 = vpop.permute.xlu0 %2031 }
 0x65d   : > { %v2034_v58 = vunpack.i.h.bf16 %v2032_v57  ;;  %v2033_v59 = vunpack.i.l.bf16 %v2032_v57 }
 0x65f   : > { %v1961_v61 = vpack.c.bf16 %v2034_v58, %v2033_v59 }
 0x663   : > { %v2051_v60 = vpop.eup %2050 }
 0x664   : > { %v1214_v1 = vmul.f32 %v2051_v60, %v2049_v54 }
 0x666   : > { %v1044_v62 = vpop.f32.mrb[6].mxu1 }
 0x667   : > { %v1874_v63 = vpop.f32.mrb[7].mxu1  ;;  %1878 = vmatmul.mubr.msk.f32.vlgmr.msra.gmra.mrb[8].mxu1 %vm624_vm2, %v1044_v62 }
 0x668   : > { %1963 = vmatpush3.bf16.msk.msra.mxu1 %vm2205_vm10, %v1961_v61  ;;  %v1447_v0 = vpop.f32.mrb[10].mxu0  ;;  %1891 = vmatprep.mubr.msk.f32.mxu1 %vm2068_vm0, %v2069_v9 }
 0x669   : > { %v1448_v3 = vadd.f32 %v1447_v0, %v2190_v50  ;;  %v1905_v5 = vpop.f32.mrb[11].mxu0  ;;  %1894 = vmatprep.subr.mxu1 %v2069_v9 }
 0x66b   : > { %1892 = vmatmul.mubr.msk.f32.vlgmr.msra.gmra.mrb[10].mxu1 %vm716_vm11, %v1214_v1  ;;  %v1451_v7 = vsel %vm704_vm7, %v1448_v3, -inf }
 0x66c   : > { %1452 = vmax.xlane.f32.xlu1 %v1451_v7  ;;  %1896 = vmatprep.mubr.msk.f32.mxu1 %vm2068_vm0, %v2069_v9 }
 0x66d   : > { %1895 = vmatpush3.msra.mxu1 %v621_v8 }
 0x66e   : > { %1968 = vmatprep.subr.bf16.mxu1 %v2066_v6 }
 0x6f9   : > { %v1453_v10 = vpop.xlane.xlu1 %1452 }
 0x6fa   : > { %v1454_v50 = vsub.f32 %v1448_v3, %v1453_v10 }
 0x6fc   : > { %v1455_v11 = vmul.f32 1.442695, %v1454_v50 }
 0x6fe   : > { %2052 = vpow2.f32 %v1455_v11 }
 0x708   : > { %v2053_v12 = vpop.eup %2052 }
 0x709   : > { %v1457_v13 = vsel %vm704_vm7, %v2053_v12, 0.0 }
 0x70a   : > { %1458 = vadd.xlane.f32.xlu1 %v1457_v13 }
 0x71b   : > { %2036 = vrot.lane.b32.xlu1 %v2209_v4, %s2075_s29 }
 0x73a   : > { %v1117_v16 = vpop.f32.mrb[8].mxu1 }
 0x73b   : > { %v1121_v17 = vadd.f32 %v1117_v16, %v873_v15  ;;  %v1879_v18 = vpop.f32.mrb[9].mxu1 }
 0x73e   : > { %v1291_v6 = vpop.f32.mrb[10].mxu1 }
 0x73f   : > { %v1893_v19 = vpop.f32.mrb[11].mxu1  ;;  %1897 = vmatmul.mubr.msk.f32.vlgmr.msra.gmra.mrb[12].mxu1 %vm624_vm2, %v1291_v6 }
 0x740   : > { %1910 = vmatprep.mubr.msk.f32.mxu1 %vm2068_vm0, %v2069_v9 }
 0x797   : > { %v1459_v20 = vpop.xlane.xlu1 %1458 }
 0x798   : > { %2054 = vrcp.f32 %v1459_v20 }
 0x79b   : > { %v2037_v21 = vpop.permute.xlu1 %2036 }
 0x79c   : > { %v2039_v22 = vunpack.i.h.bf16 %v2037_v21  ;;  %v2038_v4 = vunpack.i.l.bf16 %v2037_v21 }
 0x79e   : > { %v1969_v23 = vpack.c.bf16 %v2039_v22, %v2038_v4 }
 0x7a0   : > { %1971 = vmatpush3.bf16.msk.msra.mxu1 %vm2205_vm10, %v1969_v23 }
 0x7a1   : > { %1913 = vmatprep.subr.mxu1 %v2069_v9 }
 0x7a2   : > { %v2055_v24 = vpop.eup %2054 }
 0x7a3   : > { %v1461_v25 = vmul.f32 %v2055_v24, %v2053_v12 }
 0x7a5   : > { %1911 = vmatmul.mubr.msk.f32.vlgmr.msra.gmra.mrb[14].mxu1 %vm716_vm11, %v1461_v25 }
 0x7a6   : > { %1914 = vmatpush3.msra.mxu1 %v622_v26  ;;  %1915 = vmatprep.mubr.msk.f32.mxu1 %vm2068_vm0, %v2069_v9 }
 0x812   : > { %v1364_v27 = vpop.f32.mrb[12].mxu1 }
 0x813   : > { %v1368_v28 = vadd.f32 %v1364_v27, %v1121_v17  ;;  %v1898_v29 = vpop.f32.mrb[13].mxu1 }
 0x878   : > { %v1538_v31 = vpop.f32.mrb[14].mxu1 }
 0x879   : > { %v1912_v2 = vpop.f32.mrb[15].mxu1  ;;  %1916 = vmatmul.mubr.msk.f32.vlgmr.msra.gmra.mrb[16].mxu1 %vm624_vm2, %v1538_v31 }
 0x94c   : > { %v1611_v33 = vpop.f32.mrb[16].mxu1 }
 0x94d   : > { %v1615_v36 = vadd.f32 %v1611_v33, %v1368_v28  ;;  %v1917_v37 = vpop.f32.mrb[17].mxu1 }
 0x94f   : > { %v1617_v38 = vadd.f32 %v1616_v35, %v1615_v36 }
 0x951   : > { %v1619_v9 = vsel %vm1618_vm12, %v1617_v38, 0.0 }
 0x952   : > { %1620 = vadd.xlane.f32.xlu0 %v1619_v9 }
 0x9df   : > { %v1621_v39 = vpop.xlane.xlu0 %1620 }
 0x9e0   : > { %v1623_v34 = vmul.f32 0.03125, %v1621_v39 }
 0x9e2   : > { %v1624_v40 = vsub.f32 %v1617_v38, %v1623_v34 }
 0x9e4   : > { %v1625_v41 = vmul.f32 %v1624_v40, %v1624_v40 }
 0x9e6   : > { %v1626_v42 = vsel %vm1618_vm12, %v1625_v41, 0.0 }
 0x9e7   : > { %1627 = vadd.xlane.f32.xlu1 %v1626_v42 }
 0xa74   : > { %v1628_v43 = vpop.xlane.xlu1 %1627 }
 0xa75   : > { %v1629_v44 = vmul.f32 0.03125, %v1628_v43 }
 0xa77   : > { %v1630_v45 = vadd.f32 1e-05, %v1629_v44 }
 0xa79   : > { %2056 = vrsqrt.f32 %v1630_v45 }
 0xa83   : > { %v2057_v46 = vpop.eup %2056 }
 0xa84   : > { %v1632_v48 = vmul.f32 %v2057_v46, %v1624_v40 }
 0xa86   : > { %v1640_v32 = vmul.f32 %v1755_v47, %v1632_v48 }
 0xa88   : > { %v1648_v51 = vadd.f32 %v1756_v49, %v1640_v32 }
 0xa8a   : > { %1649 = vst.msk [vmem:[%s320_s25] sm:$0xf] %vm1618_vm12, %v1648_v51 }
 0xa8b PF: > { %s18_s27 = sadd.s32 1, %s2064_s27  }
 0xa8c   : > { %p15_p4 = scmp.ge.s32.totalorder %s18_s27, 4  }
 0xa8e   :  { %17 = sbr.rel (!%p15_p4) target bundleno = 1 (0x1), region = 85 }

</bundles_post_ra>
